<compile_context>
chip_gen: v5e
topology: v5e:2x2
jax: 0.10.0
libtpu: 0.0.40
codegen_flags: <defaults>
</compile_context>

<pallas_src>
import functools

import jax
import jax.numpy as jnp
from jax import lax
from jax.experimental import pallas as pl
from jax.experimental.pallas import tpu as pltpu

# 3200 / 300 are hard-coded in the module; the rest from opt (small, TPU friendly).
IMG_DIM = 3200
PHRASE_DIM = 300
FC_DIM = 64
ACT_DIM = 64
RNN_SIZE = 128
NUM_ACTIONS = 5
NUM_OUT_ACTIONS = NUM_ACTIONS - 1
LANE = 128


# ---------------------------------------------------------------------------
# Shape / chip helpers
# ---------------------------------------------------------------------------
def _round_up(x, m):
    return ((x + m - 1) // m) * m


def _pick_tile(total, target, align=8):
    """Split `total` rows into equal tiles (multiple of `align`), each <= ~target."""
    n_tiles = max(1, -(-total // target))
    tile = _round_up(-(-total // n_tiles), align)
    return tile, tile * n_tiles


def _chip_tuning():
    """(row-tile target, vmem_limit_bytes) for the HBM-bound gate kernel."""
    kind = ""
    try:
        kind = jax.devices()[0].device_kind.lower()
    except Exception:
        pass
    if "7" in kind:                       # v7x: 2 TCs, 64 MiB VMEM, ~3.2 TB/s HBM
        return 1024, 48 * 1024 * 1024
    if "v5e" in kind or "v5 lite" in kind or "v5lite" in kind:
        return 512, 28 * 1024 * 1024      # raise above v5e's 16 MiB scoped default
    return 512, 40 * 1024 * 1024          # v6e and default


# ---------------------------------------------------------------------------
# Kernel A: batched precompute of the input-to-hidden gate contribution.
# Grid = (batch, time-tiles), both "parallel".  The dominant 3200->64 matmul
# runs with bf16 MXU inputs / f32 accumulation.  phrase_embed is computed
# in-kernel from the per-batch phrase row (tiny 1x300 @ 300x64).
# ---------------------------------------------------------------------------
def _gates_kernel(img_ref, phr_ref, act_ref,
                  wc_ref, bc_ref, wp_ref, bp_ref,
                  wihf_ref, wiha_ref, bg_ref, gates_ref):
    img = img_ref[0]                                               # (tile_L, 3200)
    if img.dtype != jnp.bfloat16:                                  # no-op if producer
        img = img.astype(jnp.bfloat16)                             # already emits bf16
    img_fc = jnp.maximum(
        jnp.dot(img, wc_ref[...], preferred_element_type=jnp.float32)
        + bc_ref[...], 0.0)                                        # (tile_L, fc)
    emb = jnp.maximum(
        jnp.dot(phr_ref[0], wp_ref[...], preferred_element_type=jnp.float32)
        + bp_ref[...], 0.0)                                        # (1, fc)
    fuse = img_fc * emb                                            # broadcast over rows
    gates_ref[0] = (
        jnp.dot(fuse, wihf_ref[...], preferred_element_type=jnp.float32)
        + jnp.dot(act_ref[0], wiha_ref[...], preferred_element_type=jnp.float32)
        + bg_ref[...])                                             # (tile_L, 4H)


def precompute_gates(img, phr3d, act, wc_bf, bc, wp_t, bp, wihf, wiha, bg,
                     tile_L, vmem_limit):
    n, L_pad, _ = img.shape
    H4 = wihf.shape[1]
    grid = (n, L_pad // tile_L)
    # NOTE: constant-index weight blocks are not re-DMA'd per step by Pallas;
    # explicit pl.Buffered(1) single-buffering is skipped here for portability.
    return pl.pallas_call(
        _gates_kernel,
        grid=grid,
        in_specs=[
            pl.BlockSpec((1, tile_L, IMG_DIM), lambda i, t: (i, t, 0)),
            pl.BlockSpec((1, 1, PHRASE_DIM),   lambda i, t: (i, 0, 0)),
            pl.BlockSpec((1, tile_L, ACT_DIM), lambda i, t: (i, t, 0)),
            pl.BlockSpec((IMG_DIM, FC_DIM),    lambda i, t: (0, 0)),
            pl.BlockSpec((1, FC_DIM),          lambda i, t: (0, 0)),
            pl.BlockSpec((PHRASE_DIM, FC_DIM), lambda i, t: (0, 0)),
            pl.BlockSpec((1, FC_DIM),          lambda i, t: (0, 0)),
            pl.BlockSpec((FC_DIM, H4),         lambda i, t: (0, 0)),
            pl.BlockSpec((ACT_DIM, H4),        lambda i, t: (0, 0)),
            pl.BlockSpec((1, H4),              lambda i, t: (0, 0)),
        ],
        out_specs=pl.BlockSpec((1, tile_L, H4), lambda i, t: (i, t, 0)),
        out_shape=jax.ShapeDtypeStruct((n, L_pad, H4), jnp.float32),
        compiler_params=pltpu.CompilerParams(
            dimension_semantics=("parallel", "parallel"),
            vmem_limit_bytes=vmem_limit),
    )(img, phr3d, act, wc_bf, bc, wp_t, bp, wihf, wiha, bg)


# ---------------------------------------------------------------------------
# Kernel B: the LSTM recurrence only.  Single pallas_call; gates VMEM resident;
# h/c live in vregs as fori_loop carry; final state written once after the loop.
# Batch is pre-padded to 8 sublanes by the wrapper.
# ---------------------------------------------------------------------------
def _lstm_kernel(gates_ref, whh_ref, hout_ref, state_ref, *, unroll):
    L, n_pad, H4 = gates_ref.shape
    H = H4 // 4

    def step(t, carry):
        h_prev, c_prev = carry
        g = gates_ref[t] + jnp.dot(h_prev, whh_ref[...],
                                   preferred_element_type=jnp.float32)
        # PyTorch LSTMCell gate order: i, f, g, o
        i_g = jax.nn.sigmoid(g[:, 0 * H:1 * H])
        f_g = jax.nn.sigmoid(g[:, 1 * H:2 * H])
        g_g = jnp.tanh(g[:, 2 * H:3 * H])
        o_g = jax.nn.sigmoid(g[:, 3 * H:4 * H])
        c_new = f_g * c_prev + i_g * g_g
        h_new = o_g * jnp.tanh(c_new)
        hout_ref[t] = h_new
        return h_new, c_new

    h0 = jnp.zeros((n_pad, H), jnp.float32)
    c0 = jnp.zeros((n_pad, H), jnp.float32)
    h_last, c_last = lax.fori_loop(0, L, step, (h0, c0), unroll=unroll)
    state_ref[0] = h_last
    state_ref[1] = c_last


def lstm_recurrence(gates_tm, whh_t, vmem_limit):
    L, n_pad, H4 = gates_tm.shape
    H = H4 // 4
    unroll = True if L <= 16 else 4          # full unroll only for short sequences
    kern = functools.partial(_lstm_kernel, unroll=unroll)
    # TODO(synk): for very long L the gates buffer should be streamed in time
    # chunks instead of held fully VMEM-resident.
    return pl.pallas_call(
        kern,
        out_shape=(jax.ShapeDtypeStruct((L, n_pad, H), jnp.float32),
                   jax.ShapeDtypeStruct((2, n_pad, H), jnp.float32)),
        compiler_params=pltpu.CompilerParams(vmem_limit_bytes=vmem_limit),
    )(gates_tm, whh_t)


# ---------------------------------------------------------------------------
# Kernel C: act_gen head (Linear -> ReLU -> Linear -> LogSoftmax) as a batched,
# row-tiled "parallel" pass.  Output is a lane-dense 128-wide slab (W2/b2 are
# zero-padded to 128 cols); the softmax max/lse use only the 4 real columns.
# ---------------------------------------------------------------------------
def _act_head_kernel(h_ref, w1_ref, b1_ref, w2p_ref, b2p_ref, logp_ref):
    hid = jnp.maximum(
        jnp.dot(h_ref[...], w1_ref[...], preferred_element_type=jnp.float32)
        + b1_ref[...], 0.0)
    logits = (jnp.dot(hid, w2p_ref[...], preferred_element_type=jnp.float32)
              + b2p_ref[...])                                      # (tile, 128)
    col = lax.broadcasted_iota(jnp.int32, logits.shape, 1)
    valid = col < NUM_OUT_ACTIONS
    m = jnp.max(jnp.where(valid, logits, -jnp.inf), axis=-1, keepdims=True)
    s = jnp.sum(jnp.where(valid, jnp.exp(logits - m), 0.0),
                axis=-1, keepdims=True)
    logp_ref[...] = logits - (m + jnp.log(s))


def act_head(h2d, w1_t, b1, w2p_t, b2p, tile_R):
    R_pad = h2d.shape[0]
    grid = (R_pad // tile_R,)
    return pl.pallas_call(
        _act_head_kernel,
        grid=grid,
        in_specs=[
            pl.BlockSpec((tile_R, RNN_SIZE), lambda r: (r, 0)),
            pl.BlockSpec((RNN_SIZE, FC_DIM), lambda r: (0, 0)),
            pl.BlockSpec((1, FC_DIM),        lambda r: (0, 0)),
            pl.BlockSpec((FC_DIM, LANE),     lambda r: (0, 0)),
            pl.BlockSpec((1, LANE),          lambda r: (0, 0)),
        ],
        out_specs=pl.BlockSpec((tile_R, LANE), lambda r: (r, 0)),
        out_shape=jax.ShapeDtypeStruct((R_pad, LANE), jnp.float32),
        compiler_params=pltpu.CompilerParams(
            dimension_semantics=("parallel",)),
    )(h2d, w1_t, b1, w2p_t, b2p)


# ---------------------------------------------------------------------------
# Wrapper: Navigator.forward
# ---------------------------------------------------------------------------
def navigator_forward(img_feats, phrase_embs, action_inputs, params):
    """
    img_feats:     (n, L, 3200) float32 (or bfloat16 — used as-is)
    phrase_embs:   (n, 300)     float32
    action_inputs: (n, L)       int32
    returns: logprobs (n,L,4), output_feats (n,L,rnn_size), pred_feats=None,
             state = (h (1,n,rnn_size), c (1,n,rnn_size))
    """
    n, L, _ = img_feats.shape
    H = RNN_SIZE
    R = n * L

    tile_target, vmem_limit = _chip_tuning()

    # Action embedding lookup (glue gather; tiny 5-row table).
    act_feats = params['act_table'][action_inputs]                 # (n, L, act)

    # Pad the time axis so every grid step is a full, layout-legal tile
    # (no single-giant-block fallback).  Padded rows are sliced off below.
    align = 16 if img_feats.dtype == jnp.bfloat16 else 8
    tile_L, L_pad = _pick_tile(L, tile_target, align=align)
    if L_pad != L:
        img_in = jnp.pad(img_feats, ((0, 0), (0, L_pad - L), (0, 0)))
        act_in = jnp.pad(act_feats, ((0, 0), (0, L_pad - L), (0, 0)))
    else:
        img_in, act_in = img_feats, act_feats
    phr3d = phrase_embs.reshape(n, 1, PHRASE_DIM)

    gates = precompute_gates(
        img_in, phr3d, act_in,
        params['wc_bf'], params['bc'], params['wp_t'], params['bp'],
        params['wih_f_t'], params['wih_a_t'], params['bg'],
        tile_L, vmem_limit)                                        # (n, L_pad, 4H)

    # Tiny time-major transpose + pad batch to 8 sublanes for the recurrence.
    n_pad = _round_up(max(n, 1), 8)
    gates_tm = jnp.transpose(gates[:, :L, :], (1, 0, 2))           # (L, n, 4H)
    if n_pad != n:
        gates_tm = jnp.pad(gates_tm, ((0, 0), (0, n_pad - n), (0, 0)))

    hout_tm, state = lstm_recurrence(gates_tm, params['whh_t'],
                                     vmem_limit)                   # (L,n_pad,H), (2,n_pad,H)

    output_feats = jnp.transpose(hout_tm[:, :n, :], (1, 0, 2))     # (n, L, H)

    # act_gen head over all n*L rows, lane-dense output, row-tiled parallel grid.
    tile_R, R_pad = _pick_tile(R, 512, align=8)
    h2d = output_feats.reshape(R, H)
    if R_pad != R:
        h2d = jnp.pad(h2d, ((0, R_pad - R), (0, 0)))
    logp_pad = act_head(h2d, params['w1_t'], params['b1'],
                        params['w2p_t'], params['b2p'], tile_R)    # (R_pad, 128)
    logprobs = logp_pad[:R, :NUM_OUT_ACTIONS].reshape(n, L, NUM_OUT_ACTIONS)

    h_n = state[0][:n][None]                                       # (1, n, H)
    c_n = state[1][:n][None]
    # TODO(synk): feat_gen path not instantiated (use_residual=use_next=False
    # by default), so pred_feats is None just like the PyTorch module.
    pred_feats = None
    return logprobs, output_feats, pred_feats, (h_n, c_n)


# ---------------------------------------------------------------------------
# Pure-JAX reference (mirrors the PyTorch forward, full f32).
# ---------------------------------------------------------------------------
def reference_forward(img_feats, phrase_embs, action_inputs, params):
    n, L, _ = img_feats.shape
    H = RNN_SIZE
    img_fc = jax.nn.relu(img_feats @ params['wc_t'] + params['bc'])
    emb = jax.nn.relu(phrase_embs @ params['wp_t'] + params['bp'])
    act = params['act_table'][action_inputs]
    h = jnp.zeros((n, H), jnp.float32)
    c = jnp.zeros((n, H), jnp.float32)
    logps, outs = [], []
    for t in range(L):
        fuse = img_fc[:, t] * emb
        gates = (fuse @ params['wih_f_t'] + act[:, t] @ params['wih_a_t']
                 + h @ params['whh_t'] + params['bg'])
        i = jax.nn.sigmoid(gates[:, :H])
        f = jax.nn.sigmoid(gates[:, H:2 * H])
        g = jnp.tanh(gates[:, 2 * H:3 * H])
        o = jax.nn.sigmoid(gates[:, 3 * H:])
        c = f * c + i * g
        h = o * jnp.tanh(c)
        hid = jax.nn.relu(h @ params['w1_t'] + params['b1'])
        logits = hid @ params['w2_t'] + params['b2']
        logps.append(jax.nn.log_softmax(logits, axis=1))
        outs.append(h)
    return (jnp.stack(logps, 1), jnp.stack(outs, 1), None,
            (h[None], c[None]))


def init_params(key):
    ks = jax.random.split(key, 12)
    s = 0.05
    rnd = lambda k, shp: jax.random.normal(k, shp, jnp.float32) * s
    wc = rnd(ks[0], (FC_DIM, IMG_DIM));          bc = rnd(ks[1], (FC_DIM,))
    wp = rnd(ks[2], (FC_DIM, PHRASE_DIM));       bp = rnd(ks[3], (FC_DIM,))
    act_table = rnd(ks[4], (NUM_ACTIONS, ACT_DIM))
    wih = rnd(ks[5], (4 * RNN_SIZE, FC_DIM + ACT_DIM))
    bih = rnd(ks[6], (4 * RNN_SIZE,))
    whh = rnd(ks[7], (4 * RNN_SIZE, RNN_SIZE))
    bhh = rnd(ks[8], (4 * RNN_SIZE,))
    w1 = rnd(ks[9], (FC_DIM, RNN_SIZE));         b1 = rnd(ks[10], (FC_DIM,))
    w2 = rnd(ks[11], (NUM_OUT_ACTIONS, FC_DIM)); b2 = jnp.zeros((NUM_OUT_ACTIONS,))
    wc_t = wc.T
    w2_t = w2.T
    w2p_t = jnp.zeros((FC_DIM, LANE), jnp.float32).at[:, :NUM_OUT_ACTIONS].set(w2_t)
    b2p = jnp.zeros((1, LANE), jnp.float32).at[:, :NUM_OUT_ACTIONS].set(b2[None])
    return {
        'wc_t': wc_t, 'wc_bf': wc_t.astype(jnp.bfloat16),   # pre-cast once
        'bc': bc[None],
        'wp_t': wp.T, 'bp': bp[None],
        'act_table': act_table,
        'wih_f_t': wih[:, :FC_DIM].T, 'wih_a_t': wih[:, FC_DIM:].T,
        'whh_t': whh.T, 'bg': (bih + bhh)[None],
        'w1_t': w1.T, 'b1': b1[None],
        'w2_t': w2_t, 'b2': b2[None],
        'w2p_t': w2p_t, 'b2p': b2p,                          # lane-dense head weights
    }


if __name__ == "__main__":
    key = jax.random.PRNGKey(0)
    kp, ki, kph, ka = jax.random.split(key, 4)
    n, L = 2, 8

    params = init_params(kp)
    img_feats = jax.random.normal(ki, (n, L, IMG_DIM), jnp.float32)
    phrase_embs = jax.random.normal(kph, (n, PHRASE_DIM), jnp.float32)
    action_inputs = jax.random.randint(ka, (n, L), 0, NUM_ACTIONS, jnp.int32)

    out = navigator_forward(img_feats, phrase_embs, action_inputs, params)
    out = jax.block_until_ready(out)
    logp, outf, predf, (h_n, c_n) = out

    r_logp, r_outf, _, (rh, rc) = reference_forward(
        img_feats, phrase_embs, action_inputs, params)

    assert logp.shape == (n, L, NUM_OUT_ACTIONS)
    assert outf.shape == (n, L, RNN_SIZE)
    assert h_n.shape == (1, n, RNN_SIZE) and c_n.shape == (1, n, RNN_SIZE)
    assert predf is None
    # Tolerance loosened vs pure-f32 (img matmul runs with bf16 MXU inputs,
    # f32 accumulation) — observed error is O(1e-3).
    assert jnp.allclose(logp, r_logp, rtol=2e-2, atol=2e-2)
    assert jnp.allclose(outf, r_outf, rtol=2e-2, atol=2e-2)
    assert jnp.allclose(h_n, rh, rtol=2e-2, atol=2e-2)
    assert jnp.allclose(c_n, rc, rtol=2e-2, atol=2e-2)

    print("KERNEL_OK")
</pallas_src>

<mosaic_0001>
module attributes {stable_mosaic.version = 11 : i64} {
  func.func @_gates_kernel(%arg0: i32, %arg1: i32, %arg2: memref<1x8x3200xf32, #tpu.memory_space<vmem>>, %arg3: memref<1x1x300xf32, #tpu.memory_space<vmem>>, %arg4: memref<1x8x64xf32, #tpu.memory_space<vmem>>, %arg5: memref<3200x64xbf16, #tpu.memory_space<vmem>>, %arg6: memref<1x64xf32, #tpu.memory_space<vmem>>, %arg7: memref<300x64xf32, #tpu.memory_space<vmem>>, %arg8: memref<1x64xf32, #tpu.memory_space<vmem>>, %arg9: memref<64x512xf32, #tpu.memory_space<vmem>>, %arg10: memref<64x512xf32, #tpu.memory_space<vmem>>, %arg11: memref<1x512xf32, #tpu.memory_space<vmem>>, %arg12: memref<1x8x512xf32, #tpu.memory_space<vmem>>) attributes {dimension_semantics = [#tpu.dimension_semantics<parallel>, #tpu.dimension_semantics<parallel>], iteration_bounds = array<i64: 2, 1>, scalar_prefetch = 0 : i64, scratch_operands = 0 : i64, tpu.core_type = #tpu.core_type<tc>, window_params = [{transform_indices = @transform_0, window_bounds = array<i64: 1, 8, 3200>}, {transform_indices = @transform_1, window_bounds = array<i64: 1, 1, 300>}, {transform_indices = @transform_2, window_bounds = array<i64: 1, 8, 64>}, {pipeline_mode = #tpu.pipeline_mode<synchronous>, transform_indices = @transform_3, window_bounds = array<i64: 3200, 64>}, {pipeline_mode = #tpu.pipeline_mode<synchronous>, transform_indices = @transform_4, window_bounds = array<i64: 1, 64>}, {pipeline_mode = #tpu.pipeline_mode<synchronous>, transform_indices = @transform_5, window_bounds = array<i64: 300, 64>}, {pipeline_mode = #tpu.pipeline_mode<synchronous>, transform_indices = @transform_6, window_bounds = array<i64: 1, 64>}, {pipeline_mode = #tpu.pipeline_mode<synchronous>, transform_indices = @transform_7, window_bounds = array<i64: 64, 512>}, {pipeline_mode = #tpu.pipeline_mode<synchronous>, transform_indices = @transform_8, window_bounds = array<i64: 64, 512>}, {pipeline_mode = #tpu.pipeline_mode<synchronous>, transform_indices = @transform_9, window_bounds = array<i64: 1, 512>}, {transform_indices = @transform_10, window_bounds = array<i64: 1, 8, 512>}]} {
    %c0 = arith.constant 0 : index
    %c0_0 = arith.constant 0 : index
    %c0_1 = arith.constant 0 : index
    %0 = vector.load %arg2[%c0, %c0_0, %c0_1] : memref<1x8x3200xf32, #tpu.memory_space<vmem>>, vector<1x8x3200xf32>
    %1 = vector.shape_cast %0 : vector<1x8x3200xf32> to vector<8x3200xf32>
    %2 = arith.truncf %1 : vector<8x3200xf32> to vector<8x3200xbf16>
    %c0_2 = arith.constant 0 : index
    %c0_3 = arith.constant 0 : index
    %3 = vector.load %arg5[%c0_2, %c0_3] : memref<3200x64xbf16, #tpu.memory_space<vmem>>, vector<3200x64xbf16>
    %cst = arith.constant dense<0.000000e+00> : vector<8x64xf32>
    %4 = tpu.matmul %2, %3, %cst {dimension_numbers = #tpu.dot_dimension_numbers<[1], [0], [0], [1], [0, 0, 1, 1], [], []>} : vector<8x3200xbf16>, vector<3200x64xbf16>, vector<8x64xf32> -> vector<8x64xf32>
    %c0_4 = arith.constant 0 : index
    %c0_5 = arith.constant 0 : index
    %5 = vector.load %arg6[%c0_4, %c0_5] : memref<1x64xf32, #tpu.memory_space<vmem>>, vector<1x64xf32>
    %6 = vector.broadcast %5 : vector<1x64xf32> to vector<8x64xf32>
    %7 = arith.addf %4, %6 : vector<8x64xf32>
    %cst_6 = arith.constant 0.000000e+00 : f32
    %8 = vector.broadcast %cst_6 : f32 to vector<8x64xf32>
    %9 = arith.maximumf %7, %8 : vector<8x64xf32>
    %c0_7 = arith.constant 0 : index
    %c0_8 = arith.constant 0 : index
    %c0_9 = arith.constant 0 : index
    %10 = vector.load %arg3[%c0_7, %c0_8, %c0_9] : memref<1x1x300xf32, #tpu.memory_space<vmem>>, vector<1x1x300xf32>
    %11 = vector.shape_cast %10 : vector<1x1x300xf32> to vector<1x300xf32>
    %c0_10 = arith.constant 0 : index
    %c0_11 = arith.constant 0 : index
    %12 = vector.load %arg7[%c0_10, %c0_11] : memref<300x64xf32, #tpu.memory_space<vmem>>, vector<300x64xf32>
    %cst_12 = arith.constant dense<0.000000e+00> : vector<1x64xf32>
    %13 = tpu.matmul %11, %12, %cst_12 {dimension_numbers = #tpu.dot_dimension_numbers<[1], [0], [0], [1], [0, 0, 1, 1], [], []>} : vector<1x300xf32>, vector<300x64xf32>, vector<1x64xf32> -> vector<1x64xf32>
    %c0_13 = arith.constant 0 : index
    %c0_14 = arith.constant 0 : index
    %14 = vector.load %arg8[%c0_13, %c0_14] : memref<1x64xf32, #tpu.memory_space<vmem>>, vector<1x64xf32>
    %15 = arith.addf %13, %14 : vector<1x64xf32>
    %cst_15 = arith.constant 0.000000e+00 : f32
    %16 = vector.broadcast %cst_15 : f32 to vector<1x64xf32>
    %17 = arith.maximumf %15, %16 : vector<1x64xf32>
    %18 = vector.broadcast %17 : vector<1x64xf32> to vector<8x64xf32>
    %19 = arith.mulf %9, %18 : vector<8x64xf32>
    %c0_16 = arith.constant 0 : index
    %c0_17 = arith.constant 0 : index
    %20 = vector.load %arg9[%c0_16, %c0_17] : memref<64x512xf32, #tpu.memory_space<vmem>>, vector<64x512xf32>
    %cst_18 = arith.constant dense<0.000000e+00> : vector<8x512xf32>
    %21 = tpu.matmul %19, %20, %cst_18 {dimension_numbers = #tpu.dot_dimension_numbers<[1], [0], [0], [1], [0, 0, 1, 1], [], []>} : vector<8x64xf32>, vector<64x512xf32>, vector<8x512xf32> -> vector<8x512xf32>
    %c0_19 = arith.constant 0 : index
    %c0_20 = arith.constant 0 : index
    %c0_21 = arith.constant 0 : index
    %22 = vector.load %arg4[%c0_19, %c0_20, %c0_21] : memref<1x8x64xf32, #tpu.memory_space<vmem>>, vector<1x8x64xf32>
    %23 = vector.shape_cast %22 : vector<1x8x64xf32> to vector<8x64xf32>
    %c0_22 = arith.constant 0 : index
    %c0_23 = arith.constant 0 : index
    %24 = vector.load %arg10[%c0_22, %c0_23] : memref<64x512xf32, #tpu.memory_space<vmem>>, vector<64x512xf32>
    %cst_24 = arith.constant dense<0.000000e+00> : vector<8x512xf32>
    %25 = tpu.matmul %23, %24, %cst_24 {dimension_numbers = #tpu.dot_dimension_numbers<[1], [0], [0], [1], [0, 0, 1, 1], [], []>} : vector<8x64xf32>, vector<64x512xf32>, vector<8x512xf32> -> vector<8x512xf32>
    %26 = arith.addf %21, %25 : vector<8x512xf32>
    %c0_25 = arith.constant 0 : index
    %c0_26 = arith.constant 0 : index
    %27 = vector.load %arg11[%c0_25, %c0_26] : memref<1x512xf32, #tpu.memory_space<vmem>>, vector<1x512xf32>
    %28 = vector.broadcast %27 : vector<1x512xf32> to vector<8x512xf32>
    %29 = arith.addf %26, %28 : vector<8x512xf32>
    %c0_27 = arith.constant 0 : index
    %c0_28 = arith.constant 0 : index
    %c0_29 = arith.constant 0 : index
    %30 = vector.load %arg12[%c0_27, %c0_28, %c0_29] : memref<1x8x512xf32, #tpu.memory_space<vmem>>, vector<1x8x512xf32>
    %31 = vector.shape_cast %30 : vector<1x8x512xf32> to vector<8x512xf32>
    %32 = vector.shape_cast %29 : vector<8x512xf32> to vector<1x8x512xf32>
    tpu.vector_store %arg12[%c0_27, %c0_28, %c0_29], %32 {strides = array<i32>} : memref<1x8x512xf32, #tpu.memory_space<vmem>>, vector<1x8x512xf32>,
    return
  }
  func.func @transform_0(%arg0: i32, %arg1: i32) -> (i32, i32, i32) {
    %c0_i32 = arith.constant 0 : i32
    %c0_i32_0 = arith.constant 0 : i32
    return %arg0, %arg1, %c0_i32 : i32, i32, i32
  }
  func.func @transform_1(%arg0: i32, %arg1: i32) -> (i32, i32, i32) {
    %c0_i32 = arith.constant 0 : i32
    %c0_i32_0 = arith.constant 0 : i32
    %c0_i32_1 = arith.constant 0 : i32
    return %arg0, %c0_i32, %c0_i32_0 : i32, i32, i32
  }
  func.func @transform_2(%arg0: i32, %arg1: i32) -> (i32, i32, i32) {
    %c0_i32 = arith.constant 0 : i32
    %c0_i32_0 = arith.constant 0 : i32
    return %arg0, %arg1, %c0_i32 : i32, i32, i32
  }
  func.func @transform_3(%arg0: i32, %arg1: i32) -> (i32, i32) {
    %c0_i32 = arith.constant 0 : i32
    %c0_i32_0 = arith.constant 0 : i32
    %c0_i32_1 = arith.constant 0 : i32
    return %c0_i32, %c0_i32_0 : i32, i32
  }
  func.func @transform_4(%arg0: i32, %arg1: i32) -> (i32, i32) {
    %c0_i32 = arith.constant 0 : i32
    %c0_i32_0 = arith.constant 0 : i32
    %c0_i32_1 = arith.constant 0 : i32
    return %c0_i32, %c0_i32_0 : i32, i32
  }
  func.func @transform_5(%arg0: i32, %arg1: i32) -> (i32, i32) {
    %c0_i32 = arith.constant 0 : i32
    %c0_i32_0 = arith.constant 0 : i32
    %c0_i32_1 = arith.constant 0 : i32
    return %c0_i32, %c0_i32_0 : i32, i32
  }
  func.func @transform_6(%arg0: i32, %arg1: i32) -> (i32, i32) {
    %c0_i32 = arith.constant 0 : i32
    %c0_i32_0 = arith.constant 0 : i32
    %c0_i32_1 = arith.constant 0 : i32
    return %c0_i32, %c0_i32_0 : i32, i32
  }
  func.func @transform_7(%arg0: i32, %arg1: i32) -> (i32, i32) {
    %c0_i32 = arith.constant 0 : i32
    %c0_i32_0 = arith.constant 0 : i32
    %c0_i32_1 = arith.constant 0 : i32
    return %c0_i32, %c0_i32_0 : i32, i32
  }
  func.func @transform_8(%arg0: i32, %arg1: i32) -> (i32, i32) {
    %c0_i32 = arith.constant 0 : i32
    %c0_i32_0 = arith.constant 0 : i32
    %c0_i32_1 = arith.constant 0 : i32
    return %c0_i32, %c0_i32_0 : i32, i32
  }
  func.func @transform_9(%arg0: i32, %arg1: i32) -> (i32, i32) {
    %c0_i32 = arith.constant 0 : i32
    %c0_i32_0 = arith.constant 0 : i32
    %c0_i32_1 = arith.constant 0 : i32
    return %c0_i32, %c0_i32_0 : i32, i32
  }
  func.func @transform_10(%arg0: i32, %arg1: i32) -> (i32, i32, i32) {
    %c0_i32 = arith.constant 0 : i32
    %c0_i32_0 = arith.constant 0 : i32
    return %arg0, %arg1, %c0_i32 : i32, i32, i32
  }
}

</mosaic_0001>

<bundles_post_ra>
// kernel: tpu_custom_call.1
= control target key start
LH: loop header
LB: loop body
LE: loop exit
PB: predicated region body
PF: predicated region fallthrough
CT: control target
= control target key end

     0   :  { %s5205_s0 = inlined_call_operand.vmem [shape: f32[2,8,3200], index: 0, kind: input, shape index: {}]   ;;  %s5206_s1 = inlined_call_operand.vmem [shape: f32[2,1,300], index: 1, kind: input, shape index: {}]   ;;  %s5207_s2 = inlined_call_operand.vmem [shape: f32[2,8,64], index: 2, kind: input, shape index: {}]   ;;  %s5208_s3 = inlined_call_operand.vmem [shape: bf16[3200,64], index: 3, kind: input, shape index: {}]   ;;  %s5209_s4 = inlined_call_operand.vmem [shape: f32[1,64], index: 4, kind: input, shape index: {}]   ;;  %s5210_s5 = inlined_call_operand.vmem [shape: f32[300,64], index: 5, kind: input, shape index: {}]   ;;  %s5211_s6 = inlined_call_operand.vmem [shape: f32[1,64], index: 6, kind: input, shape index: {}]   ;;  %s5212_s7 = inlined_call_operand.vmem [shape: f32[64,512], index: 7, kind: input, shape index: {}]   ;;  %s5213_s8 = inlined_call_operand.vmem [shape: f32[64,512], index: 8, kind: input, shape index: {}]   ;;  %s5214_s9 = inlined_call_operand.vmem [shape: f32[1,512], index: 9, kind: input, shape index: {}]   ;;  %s5215_s10 = inlined_call_operand.hbm [shape: f32[2,8,512], index: 10, kind: output, shape index: {}]  }
   0x1   :  { %5218 = sst [smem:[#allocation8_spill]] %s5205_s0 }
   0x2   :  { %15 = vsyncpa [#allocation3], 0 }
   0x3   :  { %17 = vsyncpa [#allocation3 + $0x1], 0  ;;  %s4119_s13 = smov 0   ;;  %s4121_s14 = smov 0  }
   0x4   :  { %s4123_s15 = smov 0   ;;  %s4125_s16 = smov 0  }
   0x5   :  { %s4127_s17 = smov 0   ;;  %s4129_s18 = smov 0  }
   0x6 LB: > { %5219 = sst [smem:[#allocation5_spill]] %s4058_s17  ;;  %s2902_s19 = sadd.s32 4294967295, %s4062_s18   ;;  %s4062_s18 = sphi %s4129_s18, %s23_s18   ;;  %s4058_s17 = sphi %s4127_s17, %s5231_s17   ;;  %s4054_s16 = sphi %s4125_s16, %s5226_s16   ;;  %s4050_s15 = sphi %s4123_s15, %s5230_s15   ;;  %s4046_s14 = sphi %s4121_s14, %s5229_s14   ;;  %s4042_s13 = sphi %s4119_s13, %s5228_s13  }
   0x7   : > { %s2903_s20 = sadd.s32 4294967294, %s4062_s18   ;;  %s35_s21 = sadd.s32 1, %s4058_s17 }
   0x8   : > { %s273_s22 = sadd.s32 1, %s4050_s15  ;;  %p37_p0 = scmp.ge.s32.totalorder %s35_s21, 2 }
   0x9   : > { %p283_p1 = scmp.ne.s32.totalorder %s4050_s15, %s4046_s14  ;;  %p284_p2 = scmp.eq.s32.totalorder %s2902_s19, 1 }
   0xa   : > { %p289_p3 = scmp.ne.s32.totalorder %s4046_s14, %s4042_s13  ;;  %s5233_s21 = smov (%p37_p0, %s35_s21), 0 }
   0xb   : > { %5220 = sst [smem:[#allocation6_spill]] %s5233_s21  ;;  %p4159_p4 = por %p284_p2, %p283_p1 }
   0xc   : > { %p290_p5 = scmp.eq.s32.totalorder %s2903_s20, 1  ;;  %s268_s24 = ssub.s32 %s4058_s17, %s5233_s21 }
   0xd   : > { %p2906_p6 = scmp.ge.s32.totalorder %s4062_s18, 1  ;;  %p271_p7 = scmp.eq.s32.totalorder %s268_s24, 0 }
   0xe   : > { %p4166_p8 = por %p290_p5, %p289_p3  ;;  %p358_p9 = scmp.lt.s32.totalorder %s4062_s18, 3 }
   0xf   : > { %s4172_s26 = scalar_select %p271_p7, %s4050_s15, %s273_s22  }
  0x10   : > { %p359_p10 = pnand %p2906_p6, %p358_p9 }
  0x11   : > { %5223 = sst [smem:[#allocation7_spill]] %s4172_s26  ;;  %p411_p11 = scmp.lt.s32.totalorder (!%p359_p10), %s4054_s16, 1 }
  0x12   : > { %362 = sbr.rel (%p359_p10) target bundleno = 530 (0x212), region = 60  ;;  %s5224_s0 = sld [smem:[#allocation8_spill]] (!%p359_p10) }
  0x13   : > { %s408_s12 = sand.u32 (!%p359_p10), 1, %s4046_s14   ;;  %s3925_s19 = sshll.u32 (!%p359_p10), %s4054_s16, 5 }
  0x14   : > { %s2791_s21 = scalar_lea.hbm (!%p359_p10), %s5215_s10, %s3925_s19 }
  0x15   : > { %s2795_s29 = sshll.u32 (!%p359_p10), %s2791_s21, 4  ;;  %s2796_s29 = int_to_ptr.hbm [resolvable:$true] %s2795_s29 }
  0x17   : > { %v3732_v0 = vld [vmem:[%s5208_s3 + $0x38] sm:$0xff]  ;;  %v3731_v4 = vld [vmem:[%s5208_s3 + $0x30] sm:$0xff]  ;;  %v3730_v8 = vld [vmem:[%s5208_s3 + $0x28] sm:$0xff]  ;;  %s4236_s27 = scalar_select %p411_p11, %s4054_s16, 1  ;;  %vm2460_vm0 = vcmask 1043456   ;;  %vm2457_vm1 = vcmask 359424  }
  0x18   : > { %v3748_v1 = vld [vmem:[%s5208_s3 + $0xb8] sm:$0xff]  ;;  %2085 = vmatpush.bf16.msra.mxu0 %v3732_v0  ;;  %v3747_v5 = vld [vmem:[%s5208_s3 + $0xb0] sm:$0xff]  ;;  %v3746_v9 = vld [vmem:[%s5208_s3 + $0xa8] sm:$0xff]  ;;  %vm2592_vm2 = vcmask 523264   ;;  %s2778_s16 = scalar_lea.sflag [#allocation3], %s408_s12 }
  0x19   : > { %v3740_v2 = vld [vmem:[%s5208_s3 + $0x78] sm:$0xff]  ;;  %2111 = vmatpush.bf16.msra.mxu2 %v3748_v1  ;;  %v3739_v6 = vld [vmem:[%s5208_s3 + $0x70] sm:$0xff]  ;;  %v3738_v10 = vld [vmem:[%s5208_s3 + $0x68] sm:$0xff]  ;;  %s3926_s24 = smul.u32 200, %s4236_s27 }
  0x1a   : > { %v3756_v3 = vld [vmem:[%s5208_s3 + $0xf8] sm:$0xff]  ;;  %2098 = vmatpush.bf16.msra.mxu1 %v3740_v2  ;;  %v3755_v7 = vld [vmem:[%s5208_s3 + $0xf0] sm:$0xff]  ;;  %v3754_v11 = vld [vmem:[%s5208_s3 + $0xe8] sm:$0xff]  ;;  %s3927_s22 = smul.u32 3, %s4236_s27 }
  0x1b   : > { %2124 = vmatpush.bf16.msra.mxu3 %v3756_v3  ;;  %v3729_v12 = vld [vmem:[%s5208_s3 + $0x20] sm:$0xff]  ;;  %v3728_v16 = vld [vmem:[%s5208_s3 + $0x18] sm:$0xff]  ;;  %v3727_v20 = vld [vmem:[%s5208_s3 + $0x10] sm:$0xff]  ;;  %s4266_s26 = scalar_lea.vmem %s5224_s0, %s3926_s24  ;;  %s2907_s0 = sshll.u32 %s408_s12, 5 }
  0x1c   : > { %2086 = vmatpush.bf16.msra.mxu0 %v3731_v4  ;;  %v3745_v13 = vld [vmem:[%s5208_s3 + $0xa0] sm:$0xff]  ;;  %v3744_v17 = vld [vmem:[%s5208_s3 + $0x98] sm:$0xff]  ;;  %v3743_v21 = vld [vmem:[%s5208_s3 + $0x90] sm:$0xff]  ;;  %s423_s17 = scalar_lea.vmem %s5206_s1, %s3927_s22  ;;  %s410_s28 = scalar_lea.vmem [#allocation2], %s2907_s0 }
  0x1d   : > { %2112 = vmatpush.bf16.msra.mxu2 %v3747_v5  ;;  %v3737_v14 = vld [vmem:[%s5208_s3 + $0x60] sm:$0xff]  ;;  %v3736_v18 = vld [vmem:[%s5208_s3 + $0x58] sm:$0xff]  ;;  %v3735_v22 = vld [vmem:[%s5208_s3 + $0x50] sm:$0xff]  ;;  %s3998_s22 = sshra.s32 %s2796_s29, 4  ;;  %s4004_s24 = scalar_lea.hbm %s5215_s10, 64  ;;  %s3999_s22 = int_to_ptr.hbm [resolvable:$true] %s3998_s22 }
  0x1e   : > { %2099 = vmatpush.bf16.msra.mxu1 %v3739_v6  ;;  %v3753_v15 = vld [vmem:[%s5208_s3 + $0xe0] sm:$0xff]  ;;  %v3752_v19 = vld [vmem:[%s5208_s3 + $0xd8] sm:$0xff]  ;;  %v3751_v23 = vld [vmem:[%s5208_s3 + $0xd0] sm:$0xff]  ;;  %p4005_p1 = scmp.lt.s32.totalorder %s3999_s22, %s5215_s10 }
  0x1f   : > { %2125 = vmatpush.bf16.msra.mxu3 %v3755_v7  ;;  %v3726_v24 = vld [vmem:[%s5208_s3 + $0x8] sm:$0xff]  ;;  %v3725_v28 = vld [vmem:[%s5208_s3] sm:$0xff]  ;;  %v3764_v30 = vld [vmem:[%s5208_s3 + $0x138] sm:$0xff] }
  0x20   : > { %2087 = vmatpush.bf16.msra.mxu0 %v3730_v8  ;;  %v3742_v25 = vld [vmem:[%s5208_s3 + $0x88] sm:$0xff]  ;;  %v3741_v29 = vld [vmem:[%s5208_s3 + $0x80] sm:$0xff]  ;;  %v3780_v31 = vld [vmem:[%s5208_s3 + $0x1b8] sm:$0xff] }
  0x21   : > { %2113 = vmatpush.bf16.msra.mxu2 %v3746_v9  ;;  %v3734_v26 = vld [vmem:[%s5208_s3 + $0x48] sm:$0xff]  ;;  %v433_v32 = vld [vmem:[%s4266_s26 + $0x10] sm:$0xff]  ;;  %v431_v33 = vld [vmem:[%s4266_s26] sm:$0xff] }
  0x22   : > { %2100 = vmatpush.bf16.msra.mxu1 %v3738_v10  ;;  %v3750_v27 = vld [vmem:[%s5208_s3 + $0xc8] sm:$0xff]  ;;  %v3733_v34 = vld [vmem:[%s5208_s3 + $0x40] sm:$0xff]  ;;  %v3772_v36 = vld [vmem:[%s5208_s3 + $0x178] sm:$0xff]  ;;  %v458_v40 = vpack.c.bf16 %v433_v32, %v433_v32  ;;  %v456_v41 = vpack.c.bf16 %v431_v33, %v431_v33 }
  0x23   : > { %2126 = vmatpush.bf16.msra.mxu3 %v3754_v11  ;;  %v3749_v35 = vld [vmem:[%s5208_s3 + $0xc0] sm:$0xff]  ;;  %v3788_v37 = vld [vmem:[%s5208_s3 + $0x1f8] sm:$0xff]  ;;  %v432_v39 = vld [vmem:[%s4266_s26 + $0x8] sm:$0xff] }
  0x24   : > { %2088 = vmatpush.bf16.msra.mxu0 %v3729_v12  ;;  %v434_v38 = vld [vmem:[%s4266_s26 + $0x18] sm:$0xff]  ;;  %v3763_v42 = vld [vmem:[%s5208_s3 + $0x130] sm:$0xff]  ;;  %v457_v45 = vpack.c.bf16 %v432_v39, %v432_v39  ;;  %v3762_v48 = vld [vmem:[%s5208_s3 + $0x128] sm:$0xff] }
  0x25   : > { %2114 = vmatpush.bf16.msra.mxu2 %v3745_v13  ;;  %v3779_v43 = vld [vmem:[%s5208_s3 + $0x1b0] sm:$0xff]  ;;  %v459_v44 = vpack.c.bf16 %v434_v38, %v434_v38  ;;  %v3778_v49 = vld [vmem:[%s5208_s3 + $0x1a8] sm:$0xff]  ;;  %v3761_v52 = vld [vmem:[%s5208_s3 + $0x120] sm:$0xff] }
  0x26   : > { %2101 = vmatpush.bf16.msra.mxu1 %v3737_v14  ;;  %v3771_v46 = vld [vmem:[%s5208_s3 + $0x170] sm:$0xff]  ;;  %v3770_v50 = vld [vmem:[%s5208_s3 + $0x168] sm:$0xff]  ;;  %v3777_v53 = vld [vmem:[%s5208_s3 + $0x1a0] sm:$0xff] }
  0x27   : > { %2127 = vmatpush.bf16.msra.mxu3 %v3753_v15  ;;  %v3787_v47 = vld [vmem:[%s5208_s3 + $0x1f0] sm:$0xff]  ;;  %v3786_v51 = vld [vmem:[%s5208_s3 + $0x1e8] sm:$0xff]  ;;  %v3769_v54 = vld [vmem:[%s5208_s3 + $0x160] sm:$0xff] }
  0x28   : > { %2089 = vmatpush.bf16.msra.mxu0 %v3728_v16  ;;  %v3785_v55 = vld [vmem:[%s5208_s3 + $0x1e0] sm:$0xff]  ;;  %v3760_v56 = vld [vmem:[%s5208_s3 + $0x118] sm:$0xff]  ;;  %v3759_v60 = vld [vmem:[%s5208_s3 + $0x110] sm:$0xff] }
  0x29   : > { %2115 = vmatpush.bf16.msra.mxu2 %v3744_v17  ;;  %v3776_v57 = vld [vmem:[%s5208_s3 + $0x198] sm:$0xff]  ;;  %v3775_v61 = vld [vmem:[%s5208_s3 + $0x190] sm:$0xff]  ;;  %v3758_v0 = vld [vmem:[%s5208_s3 + $0x108] sm:$0xff] }
  0x2a   : > { %2102 = vmatpush.bf16.msra.mxu1 %v3736_v18  ;;  %v3768_v58 = vld [vmem:[%s5208_s3 + $0x158] sm:$0xff]  ;;  %v3767_v62 = vld [vmem:[%s5208_s3 + $0x150] sm:$0xff]  ;;  %v3774_v1 = vld [vmem:[%s5208_s3 + $0x188] sm:$0xff] }
  0x2b   : > { %2128 = vmatpush.bf16.msra.mxu3 %v3752_v19  ;;  %v3784_v59 = vld [vmem:[%s5208_s3 + $0x1d8] sm:$0xff]  ;;  %v3783_v63 = vld [vmem:[%s5208_s3 + $0x1d0] sm:$0xff]  ;;  %v3766_v2 = vld [vmem:[%s5208_s3 + $0x148] sm:$0xff] }
  0x2c   : > { %2090 = vmatpush.bf16.msra.mxu0 %v3727_v20  ;;  %v3782_v3 = vld [vmem:[%s5208_s3 + $0x1c8] sm:$0xff]  ;;  %v3757_v4 = vld [vmem:[%s5208_s3 + $0x100] sm:$0xff]  ;;  %v3796_v6 = vld [vmem:[%s5208_s3 + $0x238] sm:$0xff] }
  0x2d   : > { %2116 = vmatpush.bf16.msra.mxu2 %v3743_v21  ;;  %v3773_v5 = vld [vmem:[%s5208_s3 + $0x180] sm:$0xff]  ;;  %v3812_v7 = vld [vmem:[%s5208_s3 + $0x2b8] sm:$0xff]  ;;  %v437_v8 = vld [vmem:[%s4266_s26 + $0x30] sm:$0xff] }
  0x2e   : > { %2103 = vmatpush.bf16.msra.mxu1 %v3735_v22  ;;  %v435_v9 = vld [vmem:[%s4266_s26 + $0x20] sm:$0xff]  ;;  %v3804_v12 = vld [vmem:[%s5208_s3 + $0x278] sm:$0xff]  ;;  %v436_v15 = vld [vmem:[%s4266_s26 + $0x28] sm:$0xff]  ;;  %v462_v16 = vpack.c.bf16 %v437_v8, %v437_v8 }
  0x2f   : > { %2129 = vmatpush.bf16.msra.mxu3 %v3751_v23  ;;  %v3765_v10 = vld [vmem:[%s5208_s3 + $0x140] sm:$0xff]  ;;  %v3820_v13 = vld [vmem:[%s5208_s3 + $0x2f8] sm:$0xff]  ;;  %v460_v17 = vpack.c.bf16 %v435_v9, %v435_v9  ;;  %v3795_v18 = vld [vmem:[%s5208_s3 + $0x230] sm:$0xff]  ;;  %v461_v21 = vpack.c.bf16 %v436_v15, %v436_v15 }
  0x30   : > { %2091 = vmatpush.bf16.msra.mxu0 %v3726_v24  ;;  %v3781_v11 = vld [vmem:[%s5208_s3 + $0x1c0] sm:$0xff]  ;;  %v438_v14 = vld [vmem:[%s4266_s26 + $0x38] sm:$0xff]  ;;  %v3811_v19 = vld [vmem:[%s5208_s3 + $0x2b0] sm:$0xff] }
  0x31   : > { %2117 = vmatpush.bf16.msra.mxu2 %v3742_v25  ;;  %v463_v20 = vpack.c.bf16 %v438_v14, %v438_v14  ;;  %v3803_v22 = vld [vmem:[%s5208_s3 + $0x270] sm:$0xff]  ;;  %v3794_v24 = vld [vmem:[%s5208_s3 + $0x228] sm:$0xff]  ;;  %v3792_v32 = vld [vmem:[%s5208_s3 + $0x218] sm:$0xff] }
  0x32   : > { %2104 = vmatpush.bf16.msra.mxu1 %v3734_v26  ;;  %v3819_v23 = vld [vmem:[%s5208_s3 + $0x2f0] sm:$0xff]  ;;  %v3810_v25 = vld [vmem:[%s5208_s3 + $0x2a8] sm:$0xff]  ;;  %v3808_v33 = vld [vmem:[%s5208_s3 + $0x298] sm:$0xff] }
  0x33   : > { %2130 = vmatpush.bf16.msra.mxu3 %v3750_v27  ;;  %v3802_v26 = vld [vmem:[%s5208_s3 + $0x268] sm:$0xff]  ;;  %v3799_v38 = vld [vmem:[%s5208_s3 + $0x250] sm:$0xff]  ;;  %v3824_v8 = vld [vmem:[%s5208_s3 + $0x318] sm:$0xff] }
  0x34   : > { %2092 = vmatpush.bf16.msra.mxu0 %v3725_v28  ;;  %v3818_v27 = vld [vmem:[%s5208_s3 + $0x2e8] sm:$0xff]  ;;  %v3793_v28 = vld [vmem:[%s5208_s3 + $0x220] sm:$0xff]  ;;  %v3815_v39 = vld [vmem:[%s5208_s3 + $0x2d0] sm:$0xff] }
  0x35   : > { %2118 = vmatpush.bf16.msra.mxu2 %v3741_v29  ;;  %v3809_v29 = vld [vmem:[%s5208_s3 + $0x2a0] sm:$0xff]  ;;  %v3840_v9 = vld [vmem:[%s5208_s3 + $0x398] sm:$0xff]  ;;  %v3831_v14 = vld [vmem:[%s5208_s3 + $0x350] sm:$0xff] }
  0x36   : > { %2105 = vmatpush.bf16.msra.mxu1 %v3733_v34  ;;  %v3800_v34 = vld [vmem:[%s5208_s3 + $0x258] sm:$0xff]  ;;  %v3847_v15 = vld [vmem:[%s5208_s3 + $0x3d0] sm:$0xff] }
  0x37   : > { %2131 = vmatpush.bf16.msra.mxu3 %v3749_v35  ;;  %2093 = vmatmul.bf16.vlgmr.msra.gmra.mxu0 %v456_v41  ;;  %v3816_v35 = vld [vmem:[%s5208_s3 + $0x2d8] sm:$0xff]  ;;  %v3806_v41 = vld [vmem:[%s5208_s3 + $0x288] sm:$0xff] }
  0x38   : > { %2137 = vmatpush.bf16.msrb.mxu0 %v3764_v30  ;;  %2119 = vmatmul.bf16.vlgmr.msra.gmra.mxu2 %v458_v40  ;;  %v3801_v30 = vld [vmem:[%s5208_s3 + $0x260] sm:$0xff]  ;;  %v3790_v40 = vld [vmem:[%s5208_s3 + $0x208] sm:$0xff] }
  0x39   : > { %2163 = vmatpush.bf16.msrb.mxu2 %v3780_v31  ;;  %2106 = vmatmul.bf16.vlgmr.msra.gmra.mxu1 %v457_v45  ;;  %v3817_v31 = vld [vmem:[%s5208_s3 + $0x2e0] sm:$0xff] }
  0x3a   : > { %2150 = vmatpush.bf16.msrb.mxu1 %v3772_v36  ;;  %2132 = vmatmul.bf16.vlgmr.msra.gmra.mxu3 %v459_v44  ;;  %v3791_v36 = vld [vmem:[%s5208_s3 + $0x210] sm:$0xff]  ;;  %v3789_v44 = vld [vmem:[%s5208_s3 + $0x200] sm:$0xff] }
  0x3b   : > { %2176 = vmatpush.bf16.msrb.mxu3 %v3788_v37  ;;  %v3807_v37 = vld [vmem:[%s5208_s3 + $0x290] sm:$0xff]  ;;  %v3805_v45 = vld [vmem:[%s5208_s3 + $0x280] sm:$0xff] }
  0x3c   : > { %2138 = vmatpush.bf16.msrb.mxu0 %v3763_v42  ;;  %v3798_v42 = vld [vmem:[%s5208_s3 + $0x248] sm:$0xff] }
  0x3d   : > { %2164 = vmatpush.bf16.msrb.mxu2 %v3779_v43  ;;  %v3814_v43 = vld [vmem:[%s5208_s3 + $0x2c8] sm:$0xff] }
  0x3e   : > { %2151 = vmatpush.bf16.msrb.mxu1 %v3771_v46  ;;  %v439_v46 = vld [vmem:[%s4266_s26 + $0x40] sm:$0xff] }
  0x3f   : > { %2177 = vmatpush.bf16.msrb.mxu3 %v3787_v47  ;;  %v441_v47 = vld [vmem:[%s4266_s26 + $0x50] sm:$0xff] }
  0x40   : > { %2139 = vmatpush.bf16.msrb.mxu0 %v3762_v48  ;;  %v3828_v48 = vld [vmem:[%s5208_s3 + $0x338] sm:$0xff] }
  0x41   : > { %2165 = vmatpush.bf16.msrb.mxu2 %v3778_v49  ;;  %v3844_v49 = vld [vmem:[%s5208_s3 + $0x3b8] sm:$0xff] }
  0x42   : > { %2152 = vmatpush.bf16.msrb.mxu1 %v3770_v50  ;;  %v3797_v50 = vld [vmem:[%s5208_s3 + $0x240] sm:$0xff] }
  0x43   : > { %2178 = vmatpush.bf16.msrb.mxu3 %v3786_v51  ;;  %v3813_v51 = vld [vmem:[%s5208_s3 + $0x2c0] sm:$0xff] }
  0x44   : > { %2140 = vmatpush.bf16.msrb.mxu0 %v3761_v52  ;;  %v440_v52 = vld [vmem:[%s4266_s26 + $0x48] sm:$0xff] }
  0x45   : > { %2166 = vmatpush.bf16.msrb.mxu2 %v3777_v53  ;;  %v442_v53 = vld [vmem:[%s4266_s26 + $0x58] sm:$0xff] }
  0x46   : > { %2153 = vmatpush.bf16.msrb.mxu1 %v3769_v54  ;;  %v464_v54 = vpack.c.bf16 %v439_v46, %v439_v46  ;;  %v3865_v46 = vld [vmem:[%s5208_s3 + $0x460] sm:$0xff] }
  0x47   : > { %2179 = vmatpush.bf16.msrb.mxu3 %v3785_v55  ;;  %v466_v55 = vpack.c.bf16 %v441_v47, %v441_v47  ;;  %v3881_v47 = vld [vmem:[%s5208_s3 + $0x4e0] sm:$0xff] }
  0x48   : > { %2141 = vmatpush.bf16.msrb.mxu0 %v3760_v56  ;;  %v3836_v56 = vld [vmem:[%s5208_s3 + $0x378] sm:$0xff] }
  0x49   : > { %2167 = vmatpush.bf16.msrb.mxu2 %v3776_v57  ;;  %v3852_v57 = vld [vmem:[%s5208_s3 + $0x3f8] sm:$0xff] }
  0x4a   : > { %2154 = vmatpush.bf16.msrb.mxu1 %v3768_v58  ;;  %v465_v58 = vpack.c.bf16 %v440_v52, %v440_v52  ;;  %v3855_v52 = vld [vmem:[%s5208_s3 + $0x410] sm:$0xff] }
  0x4b   : > { %2180 = vmatpush.bf16.msrb.mxu3 %v3784_v59  ;;  %v467_v59 = vpack.c.bf16 %v442_v53, %v442_v53  ;;  %v3871_v53 = vld [vmem:[%s5208_s3 + $0x490] sm:$0xff] }
  0x4c   : > { %2142 = vmatpush.bf16.msrb.mxu0 %v3759_v60  ;;  %v3827_v60 = vld [vmem:[%s5208_s3 + $0x330] sm:$0xff] }
  0x4d   : > { %2168 = vmatpush.bf16.msrb.mxu2 %v3775_v61  ;;  %v3843_v61 = vld [vmem:[%s5208_s3 + $0x3b0] sm:$0xff] }
  0x4e   : > { %2155 = vmatpush.bf16.msrb.mxu1 %v3767_v62  ;;  %v3835_v62 = vld [vmem:[%s5208_s3 + $0x370] sm:$0xff] }
  0x4f   : > { %2181 = vmatpush.bf16.msrb.mxu3 %v3783_v63  ;;  %v3851_v63 = vld [vmem:[%s5208_s3 + $0x3f0] sm:$0xff] }
  0x50   : > { %2143 = vmatpush.bf16.msrb.mxu0 %v3758_v0  ;;  %v3826_v0 = vld [vmem:[%s5208_s3 + $0x328] sm:$0xff] }
  0x51   : > { %2169 = vmatpush.bf16.msrb.mxu2 %v3774_v1  ;;  %v3842_v1 = vld [vmem:[%s5208_s3 + $0x3a8] sm:$0xff] }
  0x52   : > { %2156 = vmatpush.bf16.msrb.mxu1 %v3766_v2  ;;  %v3834_v2 = vld [vmem:[%s5208_s3 + $0x368] sm:$0xff] }
  0x53   : > { %2182 = vmatpush.bf16.msrb.mxu3 %v3782_v3  ;;  %v3850_v3 = vld [vmem:[%s5208_s3 + $0x3e8] sm:$0xff] }
  0x54   : > { %2144 = vmatpush.bf16.msrb.mxu0 %v3757_v4  ;;  %v3825_v4 = vld [vmem:[%s5208_s3 + $0x320] sm:$0xff] }
  0x55   : > { %2170 = vmatpush.bf16.msrb.mxu2 %v3773_v5  ;;  %v3841_v5 = vld [vmem:[%s5208_s3 + $0x3a0] sm:$0xff] }
  0x56   : > { %2157 = vmatpush.bf16.msrb.mxu1 %v3765_v10  ;;  %v3832_v10 = vld [vmem:[%s5208_s3 + $0x358] sm:$0xff] }
  0x57   : > { %2183 = vmatpush.bf16.msrb.mxu3 %v3781_v11  ;;  %2145 = vmatmul.bf16.vlgmr.msrb.gmra.mxu0 %v460_v17  ;;  %v3848_v11 = vld [vmem:[%s5208_s3 + $0x3d8] sm:$0xff]  ;;  %v3838_v17 = vld [vmem:[%s5208_s3 + $0x388] sm:$0xff] }
  0x58   : > { %2189 = vmatpush.bf16.msra.mxu0 %v3796_v6  ;;  %2171 = vmatmul.bf16.vlgmr.msrb.gmra.mxu2 %v462_v16  ;;  %v3833_v6 = vld [vmem:[%s5208_s3 + $0x360] sm:$0xff]  ;;  %v3822_v16 = vld [vmem:[%s5208_s3 + $0x308] sm:$0xff] }
  0x59   : > { %2215 = vmatpush.bf16.msra.mxu2 %v3812_v7  ;;  %2158 = vmatmul.bf16.vlgmr.msrb.gmra.mxu1 %v461_v21  ;;  %v3849_v7 = vld [vmem:[%s5208_s3 + $0x3e0] sm:$0xff] }
  0x5a   : > { %2202 = vmatpush.bf16.msra.mxu1 %v3804_v12  ;;  %2184 = vmatmul.bf16.vlgmr.msrb.gmra.mxu3 %v463_v20  ;;  %v3823_v12 = vld [vmem:[%s5208_s3 + $0x310] sm:$0xff]  ;;  %v3821_v20 = vld [vmem:[%s5208_s3 + $0x300] sm:$0xff] }
  0x5b   : > { %2228 = vmatpush.bf16.msra.mxu3 %v3820_v13  ;;  %v3839_v13 = vld [vmem:[%s5208_s3 + $0x390] sm:$0xff]  ;;  %v3837_v21 = vld [vmem:[%s5208_s3 + $0x380] sm:$0xff] }
  0x5c   : > { %2190 = vmatpush.bf16.msra.mxu0 %v3795_v18  ;;  %v3830_v18 = vld [vmem:[%s5208_s3 + $0x348] sm:$0xff] }
  0x5d   : > { %2216 = vmatpush.bf16.msra.mxu2 %v3811_v19  ;;  %v3846_v19 = vld [vmem:[%s5208_s3 + $0x3c8] sm:$0xff] }
  0x5e   : > { %2203 = vmatpush.bf16.msra.mxu1 %v3803_v22  ;;  %v443_v22 = vld [vmem:[%s4266_s26 + $0x60] sm:$0xff] }
  0x5f   : > { %2229 = vmatpush.bf16.msra.mxu3 %v3819_v23  ;;  %v445_v23 = vld [vmem:[%s4266_s26 + $0x70] sm:$0xff] }
  0x60   : > { %2191 = vmatpush.bf16.msra.mxu0 %v3794_v24  ;;  %v3860_v24 = vld [vmem:[%s5208_s3 + $0x438] sm:$0xff] }
  0x61   : > { %2217 = vmatpush.bf16.msra.mxu2 %v3810_v25  ;;  %v3876_v25 = vld [vmem:[%s5208_s3 + $0x4b8] sm:$0xff] }
  0x62   : > { %2204 = vmatpush.bf16.msra.mxu1 %v3802_v26  ;;  %v3829_v26 = vld [vmem:[%s5208_s3 + $0x340] sm:$0xff] }
  0x63   : > { %2230 = vmatpush.bf16.msra.mxu3 %v3818_v27  ;;  %v3845_v27 = vld [vmem:[%s5208_s3 + $0x3c0] sm:$0xff] }
  0x64   : > { %2192 = vmatpush.bf16.msra.mxu0 %v3793_v28  ;;  %v444_v28 = vld [vmem:[%s4266_s26 + $0x68] sm:$0xff] }
  0x65   : > { %2218 = vmatpush.bf16.msra.mxu2 %v3809_v29  ;;  %v446_v29 = vld [vmem:[%s4266_s26 + $0x78] sm:$0xff] }
  0x66   : > { %2205 = vmatpush.bf16.msra.mxu1 %v3801_v30  ;;  %v468_v30 = vpack.c.bf16 %v443_v22, %v443_v22  ;;  %v3905_v22 = vld [vmem:[%s5208_s3 + $0x5a0] sm:$0xff] }
  0x67   : > { %2231 = vmatpush.bf16.msra.mxu3 %v3817_v31  ;;  %v470_v31 = vpack.c.bf16 %v445_v23, %v445_v23 }
  0x68   : > { %2193 = vmatpush.bf16.msra.mxu0 %v3792_v32  ;;  %v3868_v32 = vld [vmem:[%s5208_s3 + $0x478] sm:$0xff] }
  0x69   : > { %2219 = vmatpush.bf16.msra.mxu2 %v3808_v33  ;;  %v3884_v33 = vld [vmem:[%s5208_s3 + $0x4f8] sm:$0xff] }
  0x6a   : > { %2206 = vmatpush.bf16.msra.mxu1 %v3800_v34  ;;  %v469_v34 = vpack.c.bf16 %v444_v28, %v444_v28  ;;  %v3888_v28 = vld [vmem:[%s5208_s3 + $0x518] sm:$0xff] }
  0x6b   : > { %2232 = vmatpush.bf16.msra.mxu3 %v3816_v35  ;;  %v471_v35 = vpack.c.bf16 %v446_v29, %v446_v29  ;;  %v3904_v29 = vld [vmem:[%s5208_s3 + $0x598] sm:$0xff] }
  0x6c   : > { %2194 = vmatpush.bf16.msra.mxu0 %v3791_v36  ;;  %v3859_v36 = vld [vmem:[%s5208_s3 + $0x430] sm:$0xff] }
  0x6d   : > { %2220 = vmatpush.bf16.msra.mxu2 %v3807_v37  ;;  %v3875_v37 = vld [vmem:[%s5208_s3 + $0x4b0] sm:$0xff] }
  0x6e   : > { %2207 = vmatpush.bf16.msra.mxu1 %v3799_v38  ;;  %v3867_v38 = vld [vmem:[%s5208_s3 + $0x470] sm:$0xff] }
  0x6f   : > { %2233 = vmatpush.bf16.msra.mxu3 %v3815_v39  ;;  %v3883_v39 = vld [vmem:[%s5208_s3 + $0x4f0] sm:$0xff] }
  0x70   : > { %2195 = vmatpush.bf16.msra.mxu0 %v3790_v40  ;;  %v3858_v40 = vld [vmem:[%s5208_s3 + $0x428] sm:$0xff] }
  0x71   : > { %2221 = vmatpush.bf16.msra.mxu2 %v3806_v41  ;;  %v3874_v41 = vld [vmem:[%s5208_s3 + $0x4a8] sm:$0xff] }
  0x72   : > { %2208 = vmatpush.bf16.msra.mxu1 %v3798_v42  ;;  %v3866_v42 = vld [vmem:[%s5208_s3 + $0x468] sm:$0xff] }
  0x73   : > { %2234 = vmatpush.bf16.msra.mxu3 %v3814_v43  ;;  %v3882_v43 = vld [vmem:[%s5208_s3 + $0x4e8] sm:$0xff] }
  0x74   : > { %2196 = vmatpush.bf16.msra.mxu0 %v3789_v44  ;;  %v3857_v44 = vld [vmem:[%s5208_s3 + $0x420] sm:$0xff] }
  0x75   : > { %2222 = vmatpush.bf16.msra.mxu2 %v3805_v45  ;;  %v3873_v45 = vld [vmem:[%s5208_s3 + $0x4a0] sm:$0xff] }
  0x76   : > { %2209 = vmatpush.bf16.msra.mxu1 %v3797_v50  ;;  %v3864_v50 = vld [vmem:[%s5208_s3 + $0x458] sm:$0xff] }
  0x77   : > { %2235 = vmatpush.bf16.msra.mxu3 %v3813_v51  ;;  %2197 = vmatmul.bf16.vlgmr.msra.gmra.mxu0 %v464_v54  ;;  %v3880_v51 = vld [vmem:[%s5208_s3 + $0x4d8] sm:$0xff]  ;;  %v3863_v54 = vld [vmem:[%s5208_s3 + $0x450] sm:$0xff] }
  0x78   : > { %2241 = vmatpush.bf16.msrb.mxu0 %v3828_v48  ;;  %2223 = vmatmul.bf16.vlgmr.msra.gmra.mxu2 %v466_v55  ;;  %v3856_v48 = vld [vmem:[%s5208_s3 + $0x418] sm:$0xff]  ;;  %v3879_v55 = vld [vmem:[%s5208_s3 + $0x4d0] sm:$0xff] }
  0x79   : > { %2267 = vmatpush.bf16.msrb.mxu2 %v3844_v49  ;;  %2210 = vmatmul.bf16.vlgmr.msra.gmra.mxu1 %v465_v58  ;;  %v3872_v49 = vld [vmem:[%s5208_s3 + $0x498] sm:$0xff]  ;;  %v3862_v58 = vld [vmem:[%s5208_s3 + $0x448] sm:$0xff] }
  0x7a   : > { %2254 = vmatpush.bf16.msrb.mxu1 %v3836_v56  ;;  %2236 = vmatmul.bf16.vlgmr.msra.gmra.mxu3 %v467_v59  ;;  %v3854_v56 = vld [vmem:[%s5208_s3 + $0x408] sm:$0xff] }
  0x7b   : > { %2280 = vmatpush.bf16.msrb.mxu3 %v3852_v57  ;;  %v3870_v57 = vld [vmem:[%s5208_s3 + $0x488] sm:$0xff] }
  0x7c   : > { %2242 = vmatpush.bf16.msrb.mxu0 %v3827_v60  ;;  %v3878_v59 = vld [vmem:[%s5208_s3 + $0x4c8] sm:$0xff]  ;;  %v3853_v60 = vld [vmem:[%s5208_s3 + $0x400] sm:$0xff] }
  0x7d   : > { %2268 = vmatpush.bf16.msrb.mxu2 %v3843_v61  ;;  %v3869_v61 = vld [vmem:[%s5208_s3 + $0x480] sm:$0xff] }
  0x7e   : > { %2255 = vmatpush.bf16.msrb.mxu1 %v3835_v62  ;;  %v447_v62 = vld [vmem:[%s4266_s26 + $0x80] sm:$0xff] }
  0x7f   : > { %2281 = vmatpush.bf16.msrb.mxu3 %v3851_v63  ;;  %v449_v63 = vld [vmem:[%s4266_s26 + $0x90] sm:$0xff] }
  0x80   : > { %2243 = vmatpush.bf16.msrb.mxu0 %v3826_v0  ;;  %v3892_v0 = vld [vmem:[%s5208_s3 + $0x538] sm:$0xff] }
  0x81   : > { %2269 = vmatpush.bf16.msrb.mxu2 %v3842_v1  ;;  %v3908_v1 = vld [vmem:[%s5208_s3 + $0x5b8] sm:$0xff] }
  0x82   : > { %2256 = vmatpush.bf16.msrb.mxu1 %v3834_v2  ;;  %v3861_v2 = vld [vmem:[%s5208_s3 + $0x440] sm:$0xff] }
  0x83   : > { %2282 = vmatpush.bf16.msrb.mxu3 %v3850_v3  ;;  %v3877_v3 = vld [vmem:[%s5208_s3 + $0x4c0] sm:$0xff] }
  0x84   : > { %2244 = vmatpush.bf16.msrb.mxu0 %v3825_v4  ;;  %v448_v4 = vld [vmem:[%s4266_s26 + $0x88] sm:$0xff] }
  0x85   : > { %2270 = vmatpush.bf16.msrb.mxu2 %v3841_v5  ;;  %v450_v5 = vld [vmem:[%s4266_s26 + $0x98] sm:$0xff] }
  0x86   : > { %2257 = vmatpush.bf16.msrb.mxu1 %v3833_v6  ;;  %v472_v6 = vpack.c.bf16 %v447_v62, %v447_v62 }
  0x87   : > { %2283 = vmatpush.bf16.msrb.mxu3 %v3849_v7  ;;  %v474_v7 = vpack.c.bf16 %v449_v63, %v449_v63 }
  0x88   : > { %2245 = vmatpush.bf16.msrb.mxu0 %v3824_v8  ;;  %v3900_v8 = vld [vmem:[%s5208_s3 + $0x578] sm:$0xff] }
  0x89   : > { %2271 = vmatpush.bf16.msrb.mxu2 %v3840_v9  ;;  %v3916_v9 = vld [vmem:[%s5208_s3 + $0x5f8] sm:$0xff] }
  0x8a   : > { %2258 = vmatpush.bf16.msrb.mxu1 %v3832_v10  ;;  %v473_v10 = vpack.c.bf16 %v448_v4, %v448_v4  ;;  %v2449_v4 = vld [vmem:[%s5210_s5 + $0x128] sm:$0xf] }
  0x8b   : > { %2284 = vmatpush.bf16.msrb.mxu3 %v3848_v11  ;;  %v475_v11 = vpack.c.bf16 %v450_v5, %v450_v5  ;;  %v2440_v5 = vld [vmem:[%s5210_s5 + $0xe0] sm:$0xff] }
  0x8c   : > { %2246 = vmatpush.bf16.msrb.mxu0 %v3823_v12  ;;  %v3891_v12 = vld [vmem:[%s5208_s3 + $0x530] sm:$0xff] }
  0x8d   : > { %2272 = vmatpush.bf16.msrb.mxu2 %v3839_v13  ;;  %v3907_v13 = vld [vmem:[%s5208_s3 + $0x5b0] sm:$0xff] }
  0x8e   : > { %2259 = vmatpush.bf16.msrb.mxu1 %v3831_v14  ;;  %v3899_v14 = vld [vmem:[%s5208_s3 + $0x570] sm:$0xff] }
  0x8f   : > { %2285 = vmatpush.bf16.msrb.mxu3 %v3847_v15  ;;  %v3915_v15 = vld [vmem:[%s5208_s3 + $0x5f0] sm:$0xff] }
  0x90   : > { %2247 = vmatpush.bf16.msrb.mxu0 %v3822_v16  ;;  %v3890_v16 = vld [vmem:[%s5208_s3 + $0x528] sm:$0xff] }
  0x91   : > { %2273 = vmatpush.bf16.msrb.mxu2 %v3838_v17  ;;  %v3906_v17 = vld [vmem:[%s5208_s3 + $0x5a8] sm:$0xff] }
  0x92   : > { %2260 = vmatpush.bf16.msrb.mxu1 %v3830_v18  ;;  %v3898_v18 = vld [vmem:[%s5208_s3 + $0x568] sm:$0xff] }
  0x93   : > { %2286 = vmatpush.bf16.msrb.mxu3 %v3846_v19  ;;  %v3914_v19 = vld [vmem:[%s5208_s3 + $0x5e8] sm:$0xff] }
  0x94   : > { %2248 = vmatpush.bf16.msrb.mxu0 %v3821_v20  ;;  %v3983_v20 = vld [vmem:[%s5209_s4] ss:$0 sm:$0xff] }
  0x95   : > { %2274 = vmatpush.bf16.msrb.mxu2 %v3837_v21  ;;  %v3889_v21 = vld [vmem:[%s5208_s3 + $0x520] sm:$0xff] }
  0x96   : > { %2261 = vmatpush.bf16.msrb.mxu1 %v3829_v26 }
  0x97   : > { %2287 = vmatpush.bf16.msrb.mxu3 %v3845_v27  ;;  %2249 = vmatmul.bf16.vlgmr.msrb.gmra.mxu0 %v468_v30 }
  0x98   : > { %2293 = vmatpush.bf16.msra.mxu0 %v3860_v24  ;;  %2275 = vmatmul.bf16.vlgmr.msrb.gmra.mxu2 %v470_v31  ;;  %v3897_v24 = vld [vmem:[%s5208_s3 + $0x560] sm:$0xff]  ;;  %v3896_v31 = vld [vmem:[%s5208_s3 + $0x558] sm:$0xff] }
  0x99   : > { %2319 = vmatpush.bf16.msra.mxu2 %v3876_v25  ;;  %2262 = vmatmul.bf16.vlgmr.msrb.gmra.mxu1 %v469_v34  ;;  %v3913_v25 = vld [vmem:[%s5208_s3 + $0x5e0] sm:$0xff]  ;;  %v3887_v34 = vld [vmem:[%s5208_s3 + $0x510] sm:$0xff] }
  0x9a   : > { %2306 = vmatpush.bf16.msra.mxu1 %v3868_v32  ;;  %2288 = vmatmul.bf16.vlgmr.msrb.gmra.mxu3 %v471_v35  ;;  %v3912_v32 = vld [vmem:[%s5208_s3 + $0x5d8] sm:$0xff]  ;;  %v3903_v35 = vld [vmem:[%s5208_s3 + $0x590] sm:$0xff] }
  0x9b   : > { %2332 = vmatpush.bf16.msra.mxu3 %v3884_v33 }
  0x9c   : > { %2294 = vmatpush.bf16.msra.mxu0 %v3859_v36 }
  0x9d   : > { %2320 = vmatpush.bf16.msra.mxu2 %v3875_v37 }
  0x9e   : > { %2307 = vmatpush.bf16.msra.mxu1 %v3867_v38 }
  0x9f   : > { %2333 = vmatpush.bf16.msra.mxu3 %v3883_v39  ;;  %v3895_v39 = vld [vmem:[%s5208_s3 + $0x550] sm:$0xff] }
  0xa0   : > { %2295 = vmatpush.bf16.msra.mxu0 %v3858_v40  ;;  %v3911_v40 = vld [vmem:[%s5208_s3 + $0x5d0] sm:$0xff] }
  0xa1   : > { %2321 = vmatpush.bf16.msra.mxu2 %v3874_v41 }
  0xa2   : > { %2308 = vmatpush.bf16.msra.mxu1 %v3866_v42 }
  0xa3   : > { %2334 = vmatpush.bf16.msra.mxu3 %v3882_v43  ;;  %v3886_v43 = vld [vmem:[%s5208_s3 + $0x508] sm:$0xff] }
  0xa4   : > { %2296 = vmatpush.bf16.msra.mxu0 %v3857_v44  ;;  %v3902_v44 = vld [vmem:[%s5208_s3 + $0x588] sm:$0xff] }
  0xa5   : > { %2322 = vmatpush.bf16.msra.mxu2 %v3873_v45  ;;  %v3894_v45 = vld [vmem:[%s5208_s3 + $0x548] sm:$0xff] }
  0xa6   : > { %2309 = vmatpush.bf16.msra.mxu1 %v3865_v46  ;;  %v3910_v46 = vld [vmem:[%s5208_s3 + $0x5c8] sm:$0xff] }
  0xa7   : > { %2335 = vmatpush.bf16.msra.mxu3 %v3881_v47  ;;  %v3885_v47 = vld [vmem:[%s5208_s3 + $0x500] sm:$0xff] }
  0xa8   : > { %2297 = vmatpush.bf16.msra.mxu0 %v3856_v48 }
  0xa9   : > { %2323 = vmatpush.bf16.msra.mxu2 %v3872_v49  ;;  %v3901_v49 = vld [vmem:[%s5208_s3 + $0x580] sm:$0xff] }
  0xaa   : > { %2310 = vmatpush.bf16.msra.mxu1 %v3864_v50  ;;  %v451_v50 = vld [vmem:[%s4266_s26 + $0xa0] sm:$0xff] }
  0xab   : > { %2336 = vmatpush.bf16.msra.mxu3 %v3880_v51  ;;  %v453_v51 = vld [vmem:[%s4266_s26 + $0xb0] sm:$0xff] }
  0xac   : > { %2298 = vmatpush.bf16.msra.mxu0 %v3855_v52  ;;  %v3924_v52 = vld [vmem:[%s5208_s3 + $0x638] sm:$0xff] }
  0xad   : > { %2324 = vmatpush.bf16.msra.mxu2 %v3871_v53  ;;  %v2443_v53 = vld [vmem:[%s5210_s5 + $0xf8] sm:$0xff] }
  0xae   : > { %2311 = vmatpush.bf16.msra.mxu1 %v3863_v54  ;;  %v3893_v54 = vld [vmem:[%s5208_s3 + $0x540] sm:$0xff] }
  0xaf   : > { %2337 = vmatpush.bf16.msra.mxu3 %v3879_v55 }
  0xb0   : > { %2299 = vmatpush.bf16.msra.mxu0 %v3854_v56  ;;  %v3909_v56 = vld [vmem:[%s5208_s3 + $0x5c0] sm:$0xff] }
  0xb1   : > { %2325 = vmatpush.bf16.msra.mxu2 %v3870_v57  ;;  %v452_v57 = vld [vmem:[%s4266_s26 + $0xa8] sm:$0xff] }
  0xb2   : > { %2312 = vmatpush.bf16.msra.mxu1 %v3862_v58  ;;  %v454_v58 = vld [vmem:[%s4266_s26 + $0xb8] sm:$0xff]  ;;  %v477_v62 = vpack.c.bf16 %v452_v57, %v452_v57 }
  0xb3   : > { %2338 = vmatpush.bf16.msra.mxu3 %v3878_v59  ;;  %v476_v59 = vpack.c.bf16 %v451_v50, %v451_v50  ;;  %v479_v63 = vpack.c.bf16 %v454_v58, %v454_v58  ;;  %v2415_v50 = vld [vmem:[%s5210_s5 + $0x18] sm:$0xff]  ;;  %v2413_v58 = vld [vmem:[%s5210_s5 + $0x8] sm:$0xff] }
  0xb4   : > { %2300 = vmatpush.bf16.msra.mxu0 %v3853_v60  ;;  %v2094_v23 = vpop.f32.mrf.mxu0  ;;  %v478_v60 = vpack.c.bf16 %v453_v51, %v453_v51  ;;  %v455_v51 = vld [vmem:[%s4266_s26 + $0xc0] sm:$0xff]  ;;  %s2793_s26 = sshll.u32 %s410_s28, 4  ;;  %s2794_s26 = int_to_ptr.vmem [resolvable:$true] %s2793_s26 }
  0xb5   : > { %2326 = vmatpush.bf16.msra.mxu2 %v3869_v61  ;;  %v2095_v26 = vadd.f32 %v3983_v20, %v2094_v23  ;;  %v2442_v61 = vld [vmem:[%s5210_s5 + $0xf0] sm:$0xff] }
  0xb6   : > { %2313 = vmatpush.bf16.msra.mxu1 %v3861_v2  ;;  %v2107_v27 = vpop.f32.mrf.mxu1  ;;  %v2441_v2 = vld [vmem:[%s5210_s5 + $0xe8] sm:$0xff] }
  0xb7   : > { %2339 = vmatpush.bf16.msra.mxu3 %v3877_v3  ;;  %2301 = vmatmul.bf16.vlgmr.msra.gmra.mxu0 %v472_v6  ;;  %v2108_v30 = vadd.f32 %v2107_v27, %v2095_v26  ;;  %v2426_v3 = vld [vmem:[%s5210_s5 + $0x70] sm:$0xff]  ;;  %v3922_v6 = vld [vmem:[%s5208_s3 + $0x628] sm:$0xff]  ;;  %v2444_v26 = vld [vmem:[%s5210_s5 + $0x100] sm:$0xff] }
  0xb8   : > { %2345 = vmatpush.bf16.msrb.mxu0 %v3892_v0  ;;  %2327 = vmatmul.bf16.vlgmr.msra.gmra.mxu2 %v474_v7  ;;  %v2427_v0 = vld [vmem:[%s5210_s5 + $0x78] sm:$0xff]  ;;  %v2425_v7 = vld [vmem:[%s5210_s5 + $0x68] sm:$0xff] }
  0xb9   : > { %2371 = vmatpush.bf16.msrb.mxu2 %v3908_v1  ;;  %2314 = vmatmul.bf16.vlgmr.msra.gmra.mxu1 %v473_v10  ;;  %v3923_v1 = vld [vmem:[%s5208_s3 + $0x630] sm:$0xff]  ;;  %v2424_v10 = vld [vmem:[%s5210_s5 + $0x60] sm:$0xff]  ;;  %v2435_v27 = vld [vmem:[%s5210_s5 + $0xb8] sm:$0xff] }
  0xba   : > { %2358 = vmatpush.bf16.msrb.mxu1 %v3900_v8  ;;  %2340 = vmatmul.bf16.vlgmr.msra.gmra.mxu3 %v475_v11  ;;  %v2448_v8 = vld [vmem:[%s5210_s5 + $0x120] sm:$0xff]  ;;  %v2447_v11 = vld [vmem:[%s5210_s5 + $0x118] sm:$0xff] }
  0xbb   : > { %2384 = vmatpush.bf16.msrb.mxu3 %v3916_v9  ;;  %v2120_v33 = vpop.f32.mrf.mxu2  ;;  %v2439_v9 = vld [vmem:[%s5210_s5 + $0xd8] sm:$0xff] }
  0xbc   : > { %2346 = vmatpush.bf16.msrb.mxu0 %v3891_v12  ;;  %v2121_v36 = vadd.f32 %v2120_v33, %v2108_v30  ;;  %v2096_v38 = vpop.f32.mrf.mxu0  ;;  %v2438_v12 = vld [vmem:[%s5210_s5 + $0xd0] sm:$0xff]  ;;  %v2411_v30 = vld [vmem:[%s423_s17] sm:$0x7]  ;;  %s2909_s17 = sshll.u32 %s4236_s27, 3 }
  0xbd   : > { %2372 = vmatpush.bf16.msrb.mxu2 %v3907_v13  ;;  %v2133_v37 = vpop.f32.mrf.mxu3  ;;  %v3921_v13 = vld [vmem:[%s5208_s3 + $0x620] sm:$0xff]  ;;  %v2454_v33 = vperm.slane %v2411_v30, 2  ;;  %v2433_v38 = vld [vmem:[%s5210_s5 + $0xa8] sm:$0xff]  ;;  %v2453_v57 = vperm.slane %v2411_v30, 1  ;;  %s430_s30 = scalar_lea.vmem %s5207_s2, %s2909_s17 }
  0xbe   : > { %2359 = vmatpush.bf16.msrb.mxu1 %v3899_v14  ;;  %v4759_v41 = vadd.f32 %v2133_v37, %v2121_v36  ;;  %v2109_v42 = vpop.f32.mrf.mxu1  ;;  %v2423_v14 = vld [vmem:[%s5210_s5 + $0x58] sm:$0xff] }
  0xbf   : > { %2385 = vmatpush.bf16.msrb.mxu3 %v3915_v15  ;;  %v2432_v42 = vld [vmem:[%s5210_s5 + $0xa0] sm:$0xff] }
  0xc0   : > { %2347 = vmatpush.bf16.msrb.mxu0 %v3890_v16  ;;  %v2446_v16 = vld [vmem:[%s5210_s5 + $0x110] sm:$0xff] }
  0xc1   : > { %2373 = vmatpush.bf16.msrb.mxu2 %v3906_v17  ;;  %v2437_v17 = vld [vmem:[%s5210_s5 + $0xc8] sm:$0xff] }
  0xc2   : > { %2360 = vmatpush.bf16.msrb.mxu1 %v3898_v18 }
  0xc3   : > { %2386 = vmatpush.bf16.msrb.mxu3 %v3914_v19  ;;  %v2122_v48 = vpop.f32.mrf.mxu2  ;;  %v2422_v19 = vld [vmem:[%s5210_s5 + $0x50] sm:$0xff] }
  0xc4   : > { %2348 = vmatpush.bf16.msrb.mxu0 %v3889_v21  ;;  %v2445_v21 = vld [vmem:[%s5210_s5 + $0x108] sm:$0xff]  ;;  %v2430_v48 = vld [vmem:[%s5210_s5 + $0x90] sm:$0xff] }
  0xc5   : > { %2374 = vmatpush.bf16.msrb.mxu2 %v3905_v22  ;;  %v2135_v55 = vpop.f32.mrf.mxu3  ;;  %v2436_v22 = vld [vmem:[%s5210_s5 + $0xc0] sm:$0xff] }
  0xc6   : > { %2361 = vmatpush.bf16.msrb.mxu1 %v3897_v24  ;;  %v3920_v24 = vld [vmem:[%s5208_s3 + $0x618] sm:$0xff]  ;;  %v2428_v55 = vld [vmem:[%s5210_s5 + $0x80] sm:$0xff] }
  0xc7   : > { %2387 = vmatpush.bf16.msrb.mxu3 %v3913_v25  ;;  %v2421_v25 = vld [vmem:[%s5210_s5 + $0x48] sm:$0xff] }
  0xc8   : > { %2349 = vmatpush.bf16.msrb.mxu0 %v3888_v28  ;;  %v2420_v28 = vld [vmem:[%s5210_s5 + $0x40] sm:$0xff] }
  0xc9   : > { %2375 = vmatpush.bf16.msrb.mxu2 %v3904_v29 }
  0xca   : > { %2362 = vmatpush.bf16.msrb.mxu1 %v3896_v31  ;;  %v2434_v31 = vld [vmem:[%s5210_s5 + $0xb0] sm:$0xff] }
  0xcb   : > { %2388 = vmatpush.bf16.msrb.mxu3 %v3912_v32 }
  0xcc   : > { %2350 = vmatpush.bf16.msrb.mxu0 %v3887_v34  ;;  %v3919_v34 = vld [vmem:[%s5208_s3 + $0x610] sm:$0xff] }
  0xcd   : > { %2376 = vmatpush.bf16.msrb.mxu2 %v3903_v35  ;;  %v2419_v35 = vld [vmem:[%s5210_s5 + $0x38] sm:$0xff] }
  0xce   : > { %2363 = vmatpush.bf16.msrb.mxu1 %v3895_v39 }
  0xcf   : > { %2389 = vmatpush.bf16.msrb.mxu3 %v3911_v40  ;;  %v2418_v40 = vld [vmem:[%s5210_s5 + $0x30] sm:$0xff] }
  0xd0   : > { %2351 = vmatpush.bf16.msrb.mxu0 %v3886_v43  ;;  %v3918_v43 = vld [vmem:[%s5208_s3 + $0x608] sm:$0xff] }
  0xd1   : > { %2377 = vmatpush.bf16.msrb.mxu2 %v3902_v44  ;;  %v2417_v44 = vld [vmem:[%s5210_s5 + $0x28] sm:$0xff] }
  0xd2   : > { %2364 = vmatpush.bf16.msrb.mxu1 %v3894_v45  ;;  %v2431_v45 = vld [vmem:[%s5210_s5 + $0x98] sm:$0xff] }
  0xd3   : > { %2390 = vmatpush.bf16.msrb.mxu3 %v3910_v46  ;;  %v2416_v46 = vld [vmem:[%s5210_s5 + $0x20] sm:$0xff] }
  0xd4   : > { %2352 = vmatpush.bf16.msrb.mxu0 %v3885_v47  ;;  %v2146_v15 = vpop.f32.mrf.mxu0 }
  0xd5   : > { %2378 = vmatpush.bf16.msrb.mxu2 %v3901_v49  ;;  %v2147_v18 = vadd.f32 %v2146_v15, %v4759_v41  ;;  %v3917_v49 = vld [vmem:[%s5208_s3 + $0x600] sm:$0xff] }
  0xd6   : > { %2365 = vmatpush.bf16.msrb.mxu1 %v3893_v54  ;;  %v2159_v20 = vpop.f32.mrf.mxu1  ;;  %v2414_v54 = vld [vmem:[%s5210_s5 + $0x10] sm:$0xff] }
  0xd7   : > { %2391 = vmatpush.bf16.msrb.mxu3 %v3909_v56  ;;  %2353 = vmatmul.bf16.vlgmr.msrb.gmra.mxu0 %v476_v59  ;;  %v2160_v23 = vadd.f32 %v2159_v20, %v2147_v18  ;;  %v480_v56 = vpack.c.bf16 %v455_v51, %v455_v51  ;;  %v2412_v59 = vld [vmem:[%s5210_s5] sm:$0xff]  ;;  %v2570_v51 = vld [vmem:[%s5213_s8 + $0x50] sm:$0xff] }
  0xd8   : > { %2397 = vmatpush.bf16.msra.mxu0 %v3924_v52  ;;  %2379 = vmatmul.bf16.vlgmr.msrb.gmra.mxu2 %v478_v60  ;;  %v2452_v60 = vperm.slane %v2411_v30, 0  ;;  %v2584_v30 = vld [vmem:[%s5213_s8 + $0xc0] sm:$0xff] }
  0xd9   : > { %2484 = vmatpush.msra.mxu2 %v2443_v53  ;;  %2366 = vmatmul.bf16.vlgmr.msrb.gmra.mxu1 %v477_v62  ;;  %v2429_v53 = vld [vmem:[%s5210_s5 + $0x88] sm:$0xff] }
  0xda   : > { %2464 = vmatpush.msra.mxu1 %v2427_v0  ;;  %2392 = vmatmul.bf16.vlgmr.msrb.gmra.mxu3 %v479_v63 }
  0xdb   : > { %2485 = vmatpush.msra.mxu2 %v2442_v61  ;;  %3710 = vmatpush.msk.msra.mxu3 %vm2460_vm0, %v2449_v4  ;;  %v2172_v29 = vpop.f32.mrf.mxu2 }
  0xdc   : > { %2398 = vmatpush.bf16.msra.mxu0 %v3923_v1  ;;  %2465 = vmatpush.msra.mxu1 %v2426_v3  ;;  %v2173_v32 = vadd.f32 %v2172_v29, %v2160_v23  ;;  %v2148_v37 = vpop.f32.mrf.mxu0  ;;  %v2591_v29 = vld [vmem:[%s5213_s8 + $0xf8] sm:$0xff] }
  0xdd   : > { %2486 = vmatpush.msra.mxu2 %v2441_v2  ;;  %2515 = vmatpush.msra.mxu3 %v2448_v8  ;;  %v2185_v36 = vpop.f32.mrf.mxu3  ;;  %v2582_v37 = vld [vmem:[%s5213_s8 + $0xb0] sm:$0xff] }
  0xde   : > { %2466 = vmatpush.msra.mxu1 %v2425_v7  ;;  %v2186_v39 = vadd.f32 %v2185_v36, %v2173_v32  ;;  %v2161_v41 = vpop.f32.mrf.mxu1  ;;  %v2586_v32 = vld [vmem:[%s5213_s8 + $0xd0] sm:$0xff]  ;;  %v2581_v36 = vld [vmem:[%s5213_s8 + $0xa8] sm:$0xff] }
  0xdf   : > { %2487 = vmatpush.msra.mxu2 %v2440_v5  ;;  %2516 = vmatpush.msra.mxu3 %v2447_v11  ;;  %v2577_v41 = vld [vmem:[%s5213_s8 + $0x88] sm:$0xff] }
  0xe0   : > { %2399 = vmatpush.bf16.msra.mxu0 %v3922_v6  ;;  %2467 = vmatpush.msra.mxu1 %v2424_v10 }
  0xe1   : > { %2488 = vmatpush.msra.mxu2 %v2439_v9  ;;  %2517 = vmatpush.msra.mxu3 %v2446_v16 }
  0xe2   : > { %2468 = vmatpush.msra.mxu1 %v2423_v14 }
  0xe3   : > { %2489 = vmatpush.msra.mxu2 %v2438_v12  ;;  %2518 = vmatpush.msra.mxu3 %v2445_v21  ;;  %v2174_v47 = vpop.f32.mrf.mxu2 }
  0xe4   : > { %2400 = vmatpush.bf16.msra.mxu0 %v3921_v13  ;;  %2469 = vmatpush.msra.mxu1 %v2422_v19  ;;  %v2574_v47 = vld [vmem:[%s5213_s8 + $0x70] sm:$0xff] }
  0xe5   : > { %2490 = vmatpush.msra.mxu2 %v2437_v17  ;;  %2519 = vmatpush.msra.mxu3 %v2444_v26  ;;  %v2187_v52 = vpop.f32.mrf.mxu3  ;;  %v2590_v26 = vld [vmem:[%s5213_s8 + $0xf0] sm:$0xff] }
  0xe6   : > { %2470 = vmatpush.msra.mxu1 %v2421_v25  ;;  %v2589_v25 = vld [vmem:[%s5213_s8 + $0xe8] sm:$0xff]  ;;  %v2571_v52 = vld [vmem:[%s5213_s8 + $0x58] sm:$0xff] }
  0xe7   : > { %2491 = vmatpush.msra.mxu2 %v2436_v22 }
  0xe8   : > { %2401 = vmatpush.bf16.msra.mxu0 %v3920_v24  ;;  %2471 = vmatpush.msra.mxu1 %v2420_v28  ;;  %v2588_v24 = vld [vmem:[%s5213_s8 + $0xe0] sm:$0xff] }
  0xe9   : > { %2492 = vmatpush.msra.mxu2 %v2435_v27  ;;  %2604 = vmatpush.msrb.mxu3 %v2588_v24  ;;  %v2540_v24 = vld [vmem:[%s5212_s7 + $0x68] sm:$0xff] }
  0xea   : > { %2472 = vmatpush.msra.mxu1 %v2419_v35  ;;  %3711 = vmatmul.msk.f32.vlgmr.msra.gmra.mxu3 %vm2457_vm1, %v2454_v33  ;;  %v2587_v33 = vld [vmem:[%s5213_s8 + $0xd8] sm:$0xff]  ;;  %v2580_v35 = vld [vmem:[%s5213_s8 + $0xa0] sm:$0xff] }
  0xeb   : > { %2493 = vmatpush.msra.mxu2 %v2434_v31  ;;  %v2585_v31 = vld [vmem:[%s5213_s8 + $0xc8] sm:$0xff]  ;;  %2605 = vmatpush.msrb.mxu3 %v2584_v30 }
  0xec   : > { %2402 = vmatpush.bf16.msra.mxu0 %v3919_v34  ;;  %2473 = vmatpush.msra.mxu1 %v2418_v40  ;;  %v2576_v40 = vld [vmem:[%s5213_s8 + $0x80] sm:$0xff]  ;;  %v2536_v30 = vld [vmem:[%s5212_s7 + $0x48] sm:$0xff] }
  0xed   : > { %2494 = vmatpush.msra.mxu2 %v2433_v38  ;;  %2606 = vmatpush.msrb.mxu3 %v2580_v35  ;;  %v2583_v38 = vld [vmem:[%s5213_s8 + $0xb8] sm:$0xff]  ;;  %v2533_v35 = vld [vmem:[%s5212_s7 + $0x30] sm:$0xff] }
  0xee   : > { %2474 = vmatpush.msra.mxu1 %v2417_v44  ;;  %v2572_v44 = vld [vmem:[%s5213_s8 + $0x60] sm:$0xff] }
  0xef   : > { %2495 = vmatpush.msra.mxu2 %v2432_v42  ;;  %v2578_v42 = vld [vmem:[%s5213_s8 + $0x90] sm:$0xff]  ;;  %2607 = vmatpush.msrb.mxu3 %v2576_v40 }
  0xf0   : > { %2403 = vmatpush.bf16.msra.mxu0 %v3918_v43  ;;  %2475 = vmatpush.msra.mxu1 %v2416_v46  ;;  %v2579_v43 = vld [vmem:[%s5213_s8 + $0x98] sm:$0xff] }
  0xf1   : > { %2496 = vmatpush.msra.mxu2 %v2431_v45  ;;  %v2573_v45 = vld [vmem:[%s5213_s8 + $0x68] sm:$0xff]  ;;  %2608 = vmatpush.msrb.mxu3 %v2572_v44 }
  0xf2   : > { %2476 = vmatpush.msra.mxu1 %v2415_v50  ;;  %v2569_v50 = vld [vmem:[%s5213_s8 + $0x48] sm:$0xff] }
  0xf3   : > { %2497 = vmatpush.msra.mxu2 %v2430_v48  ;;  %v2575_v48 = vld [vmem:[%s5213_s8 + $0x78] sm:$0xff] }
  0xf4   : > { %2404 = vmatpush.bf16.msra.mxu0 %v3917_v49  ;;  %2477 = vmatpush.msra.mxu1 %v2414_v54  ;;  %v2198_v61 = vpop.f32.mrf.mxu0  ;;  %v2568_v49 = vld [vmem:[%s5213_s8 + $0x40] sm:$0xff]  ;;  %v2565_v54 = vld [vmem:[%s5213_s8 + $0x28] sm:$0xff] }
  0xf5   : > { %2498 = vmatpush.msra.mxu2 %v2429_v53  ;;  %v2199_v62 = vadd.f32 %v2198_v61, %v2186_v39  ;;  %v2564_v53 = vld [vmem:[%s5213_s8 + $0x20] sm:$0xff]  ;;  %2609 = vmatpush.msrb.mxu3 %v2568_v49 }
  0xf6   : > { %2478 = vmatpush.msra.mxu1 %v2413_v58  ;;  %v2211_v63 = vpop.f32.mrf.mxu1  ;;  %v2561_v58 = vld [vmem:[%s5213_s8 + $0x8] sm:$0xff]  ;;  %v2555_v61 = vld [vmem:[%s5212_s7 + $0xe0] sm:$0xff] }
  0xf7   : > { %2499 = vmatpush.msra.mxu2 %v2428_v55  ;;  %2405 = vmatmul.bf16.vlgmr.msra.gmra.mxu0 %v480_v56  ;;  %v2212_v0 = vadd.f32 %v2211_v63, %v2199_v62  ;;  %v2566_v55 = vld [vmem:[%s5213_s8 + $0x30] sm:$0xff]  ;;  %v2567_v56 = vld [vmem:[%s5213_s8 + $0x38] sm:$0xff]  ;;  %v2556_v62 = vld [vmem:[%s5212_s7 + $0xe8] sm:$0xff] }
  0xf8   : > { %2500 = vmatmul.f32.vlgmr.msra.gmra.mxu2 %v2453_v57  ;;  %2479 = vmatpush.msra.mxu1 %v2412_v59  ;;  %v2560_v57 = vld [vmem:[%s5213_s8] sm:$0xff]  ;;  %v2562_v59 = vld [vmem:[%s5213_s8 + $0x10] sm:$0xff] }
  0xf9   : > { %2480 = vmatmul.f32.vlgmr.msra.gmra.mxu1 %v2452_v60  ;;  %2624 = vmatpush.msrb.mxu0 %v2589_v25  ;;  %v2563_v60 = vld [vmem:[%s5213_s8 + $0x18] sm:$0xff]  ;;  %v2541_v25 = vld [vmem:[%s5212_s7 + $0x70] sm:$0xff] }
  0xfa   : > { %2644 = vmatpush.msrb.mxu1 %v2590_v26  ;;  %2664 = vmatpush.msrb.mxu2 %v2591_v29  ;;  %v2542_v26 = vld [vmem:[%s5212_s7 + $0x78] sm:$0xff]  ;;  %v2535_v29 = vld [vmem:[%s5212_s7 + $0x40] sm:$0xff] }
  0xfb   : > { %v2224_v1 = vpop.f32.mrf.mxu2  ;;  %2625 = vmatpush.msrb.mxu0 %v2585_v31  ;;  %2610 = vmatpush.msrb.mxu3 %v2564_v53  ;;  %v2537_v31 = vld [vmem:[%s5212_s7 + $0x50] sm:$0xff] }
  0xfc   : > { %v2225_v2 = vadd.f32 %v2224_v1, %v2212_v0  ;;  %v2200_v4 = vpop.f32.mrf.mxu0  ;;  %2645 = vmatpush.msrb.mxu1 %v2586_v32  ;;  %2665 = vmatpush.msrb.mxu2 %v2587_v33  ;;  %v2557_v0 = vld [vmem:[%s5212_s7 + $0xf0] sm:$0xff]  ;;  %v2558_v1 = vld [vmem:[%s5212_s7 + $0xf8] sm:$0xff]  ;;  %v2531_v33 = vld [vmem:[%s5212_s7 + $0x20] sm:$0xff] }
  0xfd   : > { %v2237_v3 = vpop.f32.mrf.mxu3  ;;  %2626 = vmatpush.msrb.mxu0 %v2581_v36  ;;  %2611 = vmatpush.msrb.mxu3 %v2560_v57  ;;  %v2538_v32 = vld [vmem:[%s5212_s7 + $0x58] sm:$0xff] }
  0xfe   : > { %v2238_v5 = vadd.f32 %v2237_v3, %v2225_v2  ;;  %v2213_v6 = vpop.f32.mrf.mxu1  ;;  %2646 = vmatpush.msrb.mxu1 %v2582_v37  ;;  %2666 = vmatpush.msrb.mxu2 %v2583_v38  ;;  %v2551_v2 = vld [vmem:[%s5212_s7 + $0xc0] sm:$0xff]  ;;  %v2552_v3 = vld [vmem:[%s5212_s7 + $0xc8] sm:$0xff]  ;;  %v2534_v36 = vld [vmem:[%s5212_s7 + $0x38] sm:$0xff] }
  0xff   : > { %2627 = vmatpush.msrb.mxu0 %v2577_v41  ;;  %2687 = vmatpush.msra.mxu3 %v2555_v61  ;;  %v2554_v6 = vld [vmem:[%s5212_s7 + $0xd8] sm:$0xff]  ;;  %v2527_v38 = vld [vmem:[%s5212_s7] sm:$0xff]  ;;  %v2529_v41 = vld [vmem:[%s5212_s7 + $0x10] sm:$0xff] }
 0x100   : > { %2647 = vmatpush.msrb.mxu1 %v2578_v42  ;;  %2667 = vmatpush.msrb.mxu2 %v2579_v43  ;;  %v2530_v42 = vld [vmem:[%s5212_s7 + $0x18] sm:$0xff] }
 0x101   : > { %2628 = vmatpush.msrb.mxu0 %v2573_v45  ;;  %2688 = vmatpush.msra.mxu3 %v2551_v2 }
 0x102   : > { %2648 = vmatpush.msrb.mxu1 %v2574_v47  ;;  %2668 = vmatpush.msrb.mxu2 %v2575_v48  ;;  %v2450_v48 = vld [vmem:[%s5211_s6] sm:$0x1] }
 0x103   : > { %v2226_v7 = vpop.f32.mrf.mxu2  ;;  %2629 = vmatpush.msrb.mxu0 %v2569_v50 }
 0x104   : > { %2649 = vmatpush.msrb.mxu1 %v2570_v51  ;;  %2669 = vmatpush.msrb.mxu2 %v2571_v52  ;;  %v2547_v7 = vld [vmem:[%s5212_s7 + $0xa0] sm:$0xff] }
 0x105   : > { %v2239_v8 = vpop.f32.mrf.mxu3  ;;  %2630 = vmatpush.msrb.mxu0 %v2565_v54  ;;  %2689 = vmatpush.msra.mxu3 %v2547_v7 }
 0x106   : > { %2650 = vmatpush.msrb.mxu1 %v2566_v55  ;;  %2670 = vmatpush.msrb.mxu2 %v2567_v56  ;;  %v2548_v8 = vld [vmem:[%s5212_s7 + $0xa8] sm:$0xff] }
 0x107   : > { %2631 = vmatpush.msrb.mxu0 %v2561_v58 }
 0x108   : > { %2651 = vmatpush.msrb.mxu1 %v2562_v59  ;;  %2671 = vmatpush.msrb.mxu2 %v2563_v60 }
 0x109   : > { %2707 = vmatpush.msra.mxu0 %v2556_v62 }
 0x10a   : > { %2727 = vmatpush.msra.mxu1 %v2557_v0  ;;  %2747 = vmatpush.msra.mxu2 %v2558_v1 }
 0x10b   : > { %2708 = vmatpush.msra.mxu0 %v2552_v3 }
 0x10c   : > { %2748 = vmatpush.msra.mxu2 %v2554_v6 }
 0x10d   : > { %2709 = vmatpush.msra.mxu0 %v2548_v8 }
 0x114   : > { %v2250_v9 = vpop.f32.mrf.mxu0 }
 0x115   : > { %v2251_v10 = vadd.f32 %v2250_v9, %v2238_v5  ;;  %v2553_v5 = vld [vmem:[%s5212_s7 + $0xd0] sm:$0xff] }
 0x116   : > { %v2263_v11 = vpop.f32.mrf.mxu1  ;;  %v2549_v9 = vld [vmem:[%s5212_s7 + $0xb0] sm:$0xff]  ;;  %2728 = vmatpush.msra.mxu1 %v2553_v5 }
 0x117   : > { %v2264_v12 = vadd.f32 %v2263_v11, %v2251_v10  ;;  %v2550_v10 = vld [vmem:[%s5212_s7 + $0xb8] sm:$0xff]  ;;  %v2543_v11 = vld [vmem:[%s5212_s7 + $0x80] sm:$0xff] }
 0x118   : > { %2729 = vmatpush.msra.mxu1 %v2549_v9  ;;  %2749 = vmatpush.msra.mxu2 %v2550_v10 }
 0x119   : > { %2690 = vmatpush.msra.mxu3 %v2543_v11 }
 0x11b   : > { %v2276_v13 = vpop.f32.mrf.mxu2 }
 0x11c   : > { %v2277_v14 = vadd.f32 %v2276_v13, %v2264_v12  ;;  %v2252_v16 = vpop.f32.mrf.mxu0  ;;  %v2544_v12 = vld [vmem:[%s5212_s7 + $0x88] sm:$0xff]  ;;  %v2545_v13 = vld [vmem:[%s5212_s7 + $0x90] sm:$0xff] }
 0x11d   : > { %v2289_v15 = vpop.f32.mrf.mxu3  ;;  %v2559_v16 = vld [vmem:[%s430_s30] sm:$0xff]  ;;  %2710 = vmatpush.msra.mxu0 %v2544_v12  ;;  %2730 = vmatpush.msra.mxu1 %v2545_v13  ;;  %s4000_s30 = scalar_lea.hbm %s3999_s22, 32 }
 0x11e   : > { %v4933_v17 = vadd.f32 %v2289_v15, %v2277_v14  ;;  %v2265_v18 = vpop.f32.mrf.mxu1  ;;  %v2546_v15 = vld [vmem:[%s5212_s7 + $0x98] sm:$0xff]  ;;  %3712 = vmatmul.msk.f32.vlgmr.msrb.gmra.mxu3 %vm2592_vm2, %v2559_v16  ;;  %3713 = vmatmul.msk.f32.vlgmr.msrb.gmra.mxu0 %vm2592_vm2, %v2559_v16  ;;  %p4001_p12 = scmp.ne.s32.totalorder %s3999_s22, %s4000_s30  ;;  %p4006_p2 = scmp.lt.s32.totalorder %s4004_s24, %s4000_s30 }
 0x11f   : > { %2750 = vmatpush.msra.mxu2 %v2546_v15  ;;  %3714 = vmatmul.msk.f32.vlgmr.msrb.gmra.mxu1 %vm2592_vm2, %v2559_v16 }
 0x120   : > { %3715 = vmatmul.msk.f32.vlgmr.msrb.gmra.mxu2 %vm2592_vm2, %v2559_v16  ;;  %2711 = vmatpush.msra.mxu0 %v2540_v24  ;;  %p4002_p13 = pnand %p4001_p12, %p4159_p4  ;;  %p4007_p3 = por %p4006_p2, %p4005_p1 }
 0x121   : > { %2731 = vmatpush.msra.mxu1 %v2541_v25  ;;  %2751 = vmatpush.msra.mxu2 %v2542_v26 }
 0x122   : > { %2712 = vmatpush.msra.mxu0 %v2536_v30  ;;  %p4003_p0 = pneg %p4002_p13 }
 0x123   : > { %v2278_v19 = vpop.f32.mrf.mxu2  ;;  %2732 = vmatpush.msra.mxu1 %v2537_v31  ;;  %2752 = vmatpush.msra.mxu2 %v2538_v32 }
 0x124   : > { %p4008_p5 = pnand %p4007_p3, %p4003_p0 }
 0x125   : > { %v2291_v20 = vpop.f32.mrf.mxu3  ;;  %2733 = vmatpush.msra.mxu1 %v2533_v35  ;;  %2753 = vmatpush.msra.mxu2 %v2534_v36 }
 0x126   : > { %v2539_v20 = vld [vmem:[%s5212_s7 + $0x60] sm:$0xff] }
 0x127   : > { %2691 = vmatpush.msra.mxu3 %v2539_v20  ;;  %2734 = vmatpush.msra.mxu1 %v2529_v41 }
 0x128   : > { %2754 = vmatpush.msra.mxu2 %v2530_v42 }
 0x129   : > { %2692 = vmatpush.msra.mxu3 %v2535_v29 }
 0x12b   : > { %2693 = vmatpush.msra.mxu3 %v2531_v33 }
 0x12d   : > { %2694 = vmatpush.msra.mxu3 %v2527_v38 }
 0x134   : > { %v4935_v21 = vpop.f32.mrf.mxu0 }
 0x135   : > { %v2303_v40 = vadd.f32 %v4935_v21, %v4933_v17 }
 0x136   : > { %v4937_v22 = vpop.f32.mrf.mxu1 }
 0x137   : > { %v2316_v44 = vadd.f32 %v4937_v22, %v2303_v40 }
 0x13b   : > { %v4939_v23 = vpop.f32.mrf.mxu2 }
 0x13c   : > { %v2304_v28 = vpop.f32.mrf.mxu0  ;;  %v2329_v17 = vadd.f32 %v4939_v23, %v2316_v44 }
 0x13d   : > { %v4950_v27 = vpop.f32.mrf.mxu3 }
 0x13e   : > { %v2317_v34 = vpop.f32.mrf.mxu1  ;;  %v2342_v21 = vadd.f32 %v4950_v27, %v2329_v17 }
 0x13f   : > { %v2532_v34 = vld [vmem:[%s5212_s7 + $0x28] sm:$0xff] }
 0x140   : > { %2713 = vmatpush.msra.mxu0 %v2532_v34 }
 0x143   : > { %v2330_v39 = vpop.f32.mrf.mxu2 }
 0x144   : > { %v2528_v39 = vld [vmem:[%s5212_s7 + $0x8] sm:$0xff] }
 0x145   : > { %v2343_v46 = vpop.f32.mrf.mxu3  ;;  %2714 = vmatpush.msra.mxu0 %v2528_v39 }
 0x154   : > { %v5045_v63 = vpop.f32.mrf.mxu0 }
 0x155   : > { %v2355_v45 = vadd.f32 %v5045_v63, %v2342_v21  ;;  %v2759_v63 = vld [vmem:[%s5214_s9] sm:$0xf] }
 0x156   : > { %v5060_v4 = vpop.f32.mrf.mxu1  ;;  %v2762_v1 = vperm.slane %v2759_v63, 1  ;;  %v2763_v3 = vperm.slane %v2759_v63, 2  ;;  %v2761_v9 = vperm.slane %v2759_v63, 0  ;;  %v2764_v11 = vperm.slane %v2759_v63, 3 }
 0x157   : > { %v2368_v47 = vadd.f32 %v5060_v4, %v2355_v45 }
 0x15b   : > { %v2380_v14 = vpop.f32.mrf.mxu2 }
 0x15c   : > { %v2356_v19 = vpop.f32.mrf.mxu0  ;;  %v2381_v49 = vadd.f32 %v2380_v14, %v2368_v47 }
 0x15d   : > { %v2393_v18 = vpop.f32.mrf.mxu3 }
 0x15e   : > { %v2369_v28 = vpop.f32.mrf.mxu1  ;;  %v2394_v54 = vadd.f32 %v2393_v18, %v2381_v49 }
 0x163   : > { %v2382_v37 = vpop.f32.mrf.mxu2 }
 0x165   : > { %v2395_v43 = vpop.f32.mrf.mxu3 }
 0x16d   : > { %v2521_v53 = vpop.f32.mrf.mxu3 }
 0x174   : > { %v2406_v46 = vpop.f32.mrf.mxu0 }
 0x175   : > { %v2407_v55 = vadd.f32 %v2406_v46, %v2394_v54 }
 0x176   : > { %v2481_v50 = vpop.f32.mrf.mxu1 }
 0x177   : > { %v2482_v51 = vadd.f32 %v2481_v50, %v2450_v48  ;;  %v2410_v57 = vmax.f32 %v2407_v55, 0.0 }
 0x17b   : > { %v2501_v52 = vpop.f32.mrf.mxu2 }
 0x17c   : > { %v2502_v22 = vadd.f32 %v2501_v52, %v2482_v51  ;;  %v2408_v23 = vpop.f32.mrf.mxu0 }
 0x17e   : > { %v2522_v27 = vadd.f32 %v2521_v53, %v2502_v22 }
 0x180   : > { %v2524_v56 = vmax.f32 %v2522_v27, 0.0 }
 0x182   : > { %v2525_v58 = vperm.slane %v2524_v56, 0 }
 0x184   : > { %v2526_v59 = vmul.f32 %v2525_v58, %v2410_v57 }
 0x186   : > { %3716 = vmatmul.msk.f32.vlgmr.msra.gmra.mxu3 %vm2592_vm2, %v2526_v59  ;;  %3717 = vmatmul.msk.f32.vlgmr.msra.gmra.mxu0 %vm2592_vm2, %v2526_v59 }
 0x187   : > { %3718 = vmatmul.msk.f32.vlgmr.msra.gmra.mxu1 %vm2592_vm2, %v2526_v59  ;;  %3719 = vmatmul.msk.f32.vlgmr.msra.gmra.mxu2 %vm2592_vm2, %v2526_v59 }
 0x19b   : > { %v2633_v60 = vpop.f32.mrf.mxu0 }
 0x19c   : > { %v2653_v61 = vpop.f32.mrf.mxu1 }
 0x1a1   : > { %v2613_v62 = vpop.f32.mrf.mxu3 }
 0x1a3   : > { %v2673_v0 = vpop.f32.mrf.mxu2 }
 0x203   : > { %v2716_v2 = vpop.f32.mrf.mxu0 }
 0x204   : > { %v2717_v4 = vadd.f32 %v2716_v2, %v2633_v60  ;;  %v2736_v5 = vpop.f32.mrf.mxu1 }
 0x205   : > { %v2737_v6 = vadd.f32 %v2736_v5, %v2653_v61 }
 0x206   : > { %v2770_v7 = vadd.f32 %v2762_v1, %v2717_v4 }
 0x207   : > { %v2771_v8 = vadd.f32 %v2763_v3, %v2737_v6 }
 0x208   : > { %2774 = vst [vmem:[%s410_s28 + $0x8] sm:$0xff] %v2770_v7 }
 0x209   : > { %2775 = vst [vmem:[%s410_s28 + $0x10] sm:$0xff] %v2771_v8  ;;  %v2696_v10 = vpop.f32.mrf.mxu3 }
 0x20a   : > { %v2697_v12 = vadd.f32 %v2696_v10, %v2613_v62  ;;  %v2756_v13 = vpop.f32.mrf.mxu2 }
 0x20b   : > { %v2757_v14 = vadd.f32 %v2756_v13, %v2673_v0 }
 0x20c   : > { %v2769_v15 = vadd.f32 %v2761_v9, %v2697_v12 }
 0x20d   : > { %v2772_v16 = vadd.f32 %v2764_v11, %v2757_v14 }
 0x20e   : > { %2773 = vst [vmem:[%s410_s28] sm:$0xff] %v2769_v15 }
 0x20f   : > { %2776 = vst [vmem:[%s410_s28 + $0x18] sm:$0xff] %v2772_v16 }
 0x210   : > { %4011 = shalt.err (!%p4008_p5)
}
 0x211   : > { %3928 = dma.vmem_to_hbm [thread:$0]  (%p4159_p4), %s2794_s26, 512, %s2796_s29, %s2778_s16  }
 0x212 PF: > { %p3934_p6 = scmp.ge.s32.totalorder %s4062_s18, 2  ;;  %s2807_s12 = sand.u32 1, %s4042_s13  }
 0x213   : > { %s2808_s20 = scalar_lea.sflag [#allocation3], %s2807_s12 }
 0x214   : > { %p3931_p7 = pnand %p3934_p6, %p4166_p8 }
 0x216   : > { %p3932_p9 = pneg %p3931_p7 }
 0x218   : > { %4037 = dma.done.wait (%p3932_p9), %s2808_s20, 512  }
 0x219   : > { %4039 = vsyncadd (%p3932_p9), %s2808_s20, 4294966784  ;;  %s23_s18 = sadd.s32 1, %s4062_s18   ;;  %s5225_s17 = sld [smem:[#allocation7_spill]] }
 0x21a   : > { %p20_p10 = scmp.ge.s32.totalorder %s23_s18, 4   ;;  %s5226_s16 = sld [smem:[#allocation5_spill]] }
 0x21b   : > { %s5227_s23 = sld [smem:[#allocation6_spill]]  ;;  %s5228_s13 = smov %s4046_s14 }
 0x21c   : > { %s5229_s14 = smov %s4050_s15 }
 0x21d   :  { %22 = sbr.rel (!%p20_p10) target bundleno = 6 (0x6), region = 101 }
 0x21f   : > { %s5230_s15 = smov %s5225_s17 }
 0x221   : > { %s5231_s17 = smov %s5227_s23 }
 0x222   :  { %2814 = vsyncpa [#allocation3], 1 }
 0x223   :  { %2816 = vsyncpa [#allocation3 + $0x1], 1 }

</bundles_post_ra>
